<compile_context>
chip_gen: v6e
topology: v6e:2x2x1
jax: 0.10.0
libtpu: 0.0.40
codegen_flags: <defaults>
</compile_context>

<pallas_src>
import functools

import jax
import jax.numpy as jnp
import numpy as np
from jax.experimental import pallas as pl
from jax.experimental.pallas import tpu as pltpu

CROSS_LN_EPS = 1e-5   # nn.RMSNorm(h, eps=1e-5)
BLOCK_LN_EPS = 1e-6   # Gemma decoder-layer RMSNorms


def _rms(x, w, eps):
    var = jnp.mean(x * x, axis=-1, keepdims=True)
    return x * jax.lax.rsqrt(var + eps) * w


# ------------------------------ fused kernel --------------------------------

def fused_module_block_kernel(xm_ref, xb_ref, mask_ref,
                              fb_wgw_ref, fb_bg_ref,
                              dr_wgw_ref, dr_bg_ref,
                              cln_ref, wq_ref, wkv_ref, wo_ref,
                              ln1_ref, ln2_ref, wgu_ref, wdown_ref,
                              xo_ref, delta_ref,
                              ctx_ref,
                              *, batch, sq, skv, num_heads, head_dim):
    f32, bf = jnp.float32, jnp.bfloat16
    H = xm_ref.shape[-1]
    D = num_heads * head_dim
    I = wdown_ref.shape[0]

    xm = xm_ref[...]                    # (B*Sq,  H) f32
    xb_b = xb_ref[...]                  # (B*Skv, H) bf16 (cast at the call boundary)
    xm_b = xm.astype(bf)

    # ---- feedback highway: delta = sigmoid(x_mod@Wg + b) * (x_mod@Ww) ------
    fb = jnp.dot(xm_b, fb_wgw_ref[...], preferred_element_type=f32)      # (B*Sq, 2H)
    delta_ref[...] = jax.nn.sigmoid(fb[:, :H] + fb_bg_ref[...]) * fb[:, H:]

    # ---- driver highway on x_back ------------------------------------------
    dr = jnp.dot(xb_b, dr_wgw_ref[...], preferred_element_type=f32)      # (B*Skv, 2H)
    drv = jax.nn.sigmoid(dr[:, :H] + dr_bg_ref[...]) * dr[:, H:]

    # ---- cross attention (rotary_emb is None, dropout is an eval no-op) ----
    qn = _rms(xm, cln_ref[...], CROSS_LN_EPS).astype(bf)                 # (B*Sq, H)
    # hd^-0.5 scale pre-folded into wq (weight prep).
    q = jnp.dot(qn, wq_ref[...], preferred_element_type=f32)             # (B*Sq, D)
    kv = jnp.dot(xb_b, wkv_ref[...], preferred_element_type=f32)         # (B*Skv, 2D)

    # head_dim == 128 -> each head is exactly one 128-lane column tile; use static,
    # aligned lane/sublane slices (no reshape/transpose relayouts, no concatenate).
    # TODO(synk): at production Skv replace this with a flash-style streamed K/V loop.
    for b in range(batch):
        m_b = mask_ref[b]                                                # (Sq, Skv) f32 additive
        qr = slice(b * sq, (b + 1) * sq)
        kr = slice(b * skv, (b + 1) * skv)
        for h in range(num_heads):
            ck = slice(h * head_dim, (h + 1) * head_dim)
            cv = slice(D + h * head_dim, D + (h + 1) * head_dim)
            qb = q[qr, ck].astype(bf)                                    # (Sq,  hd)
            kb = kv[kr, ck].astype(bf)                                   # (Skv, hd)
            vb = kv[kr, cv].astype(bf)                                   # (Skv, hd)
            s = jnp.einsum('qd,kd->qk', qb, kb,
                           preferred_element_type=f32)                   # (Sq, Skv)
            s = s + m_b
            s = s - jnp.max(s, axis=-1, keepdims=True)
            p = jnp.exp(s)
            p = p * pl.reciprocal(jnp.sum(p, axis=-1, keepdims=True), approx=True)
            ctx_ref[qr, ck] = jnp.dot(p.astype(bf), vb,
                                      preferred_element_type=f32)        # (Sq, hd) f32

    # single large output projection: M = B*Sq rows
    mod = jnp.dot(ctx_ref[...].astype(bf), wo_ref[...],
                  preferred_element_type=f32)                            # (B*Sq, H)

    # ---- Gemma decoder block with self_attn := Identity --------------------
    x = xm + mod + drv
    h1 = x + _rms(x, ln1_ref[...], BLOCK_LN_EPS)
    h2 = _rms(h1, ln2_ref[...], BLOCK_LN_EPS).astype(bf)
    # TODO(synk): tile the I dimension with a VMEM accumulator at production I.
    gu = jnp.dot(h2, wgu_ref[...], preferred_element_type=f32)           # (B*Sq, 2I)
    mlp_in = (jax.nn.gelu(gu[:, :I], approximate=True) * gu[:, I:]).astype(bf)
    xo_ref[...] = h1 + jnp.dot(mlp_in, wdown_ref[...], preferred_element_type=f32)


# ------------------------------ wrapper --------------------------------------

def prep_params(rp):
    """Concatenate paired weights, fold the softmax scale into Wq, cast matmul
    weights to bf16 (biases / LN weights stay f32)."""
    bf = jnp.bfloat16
    scale = rp['head_dim'] ** -0.5
    return dict(
        num_heads=rp['num_heads'], head_dim=rp['head_dim'],
        fb_wgw=jnp.concatenate([rp['fb_wg'], rp['fb_ww']], axis=1).astype(bf),
        fb_bg=rp['fb_bg'],
        dr_wgw=jnp.concatenate([rp['dr_wg'], rp['dr_ww']], axis=1).astype(bf),
        dr_bg=rp['dr_bg'],
        cross_ln_w=rp['cross_ln_w'],
        wq=(rp['wq'] * scale).astype(bf),
        wkv=jnp.concatenate([rp['wk'], rp['wv']], axis=1).astype(bf),
        wo=rp['wo'].astype(bf),
        ln1=rp['ln1'], ln2=rp['ln2'],
        wgu=jnp.concatenate([rp['wgate'], rp['wup']], axis=1).astype(bf),
        wdown=rp['wdown'].astype(bf),
    )


def module_block_forward(pp, x_mod, x_back, mask=None):
    B, Sq, H = x_mod.shape
    Skv = x_back.shape[1]
    assert Skv == Sq, "driver(x_back) is added to x_mod: sequence lengths must match"
    nh, hd = pp['num_heads'], pp['head_dim']
    D = nh * hd

    # Fold batch into the matmul row dimension (free, outside-the-kernel reshapes).
    xm2 = x_mod.reshape(B * Sq, H)
    xb2 = x_back.reshape(B * Skv, H).astype(jnp.bfloat16)   # consumed only as bf16 operand

    # mask is the module's Optional additive attention mask (broadcast over heads).
    # TODO(synk): for production causal masks, generate in-kernel via broadcasted_iota
    #             instead of DMA-ing Sq*Skv floats per batch.
    if mask is None:
        mask3 = jnp.zeros((B, Sq, Skv), jnp.float32)
    else:
        if mask.ndim == 4:                       # (B, 1, Sq, Skv) HF-style
            mask3 = mask[:, 0]
        else:
            mask3 = mask
        mask3 = jnp.broadcast_to(mask3, (B, Sq, Skv)).astype(jnp.float32)

    kern = functools.partial(fused_module_block_kernel,
                             batch=B, sq=Sq, skv=Skv, num_heads=nh, head_dim=hd)

    # No grid: a single fused invocation; whole (small) operands live in VMEM and
    # weights are fetched exactly once (single buffer each).
    x_out2, delta2 = pl.pallas_call(
        kern,
        out_shape=(jax.ShapeDtypeStruct((B * Sq, H), jnp.float32),
                   jax.ShapeDtypeStruct((B * Sq, H), jnp.float32)),
        scratch_shapes=[pltpu.VMEM((B * Sq, D), jnp.float32)],
        compiler_params=pltpu.CompilerParams(
            # Tiny at these shapes; re-derive from resident weights + tiles at
            # production shapes (v7x has half the VMEM of v5e/v6e).
            vmem_limit_bytes=32 * 1024 * 1024),
    )(xm2, xb2, mask3,
      pp['fb_wgw'], pp['fb_bg'], pp['dr_wgw'], pp['dr_bg'],
      pp['cross_ln_w'], pp['wq'], pp['wkv'], pp['wo'],
      pp['ln1'], pp['ln2'], pp['wgu'], pp['wdown'])
    return x_out2.reshape(B, Sq, H), delta2.reshape(B, Sq, H)


# --------------------------- pure-JAX references -----------------------------

def module_block_ref_prepped(pp, x_mod, x_back, mask3):
    """Same math as the kernel (bf16 operands, f32 accumulation), in plain JAX."""
    f32, bf = jnp.float32, jnp.bfloat16
    B, Sq, H = x_mod.shape
    Skv = x_back.shape[1]
    nh, hd = pp['num_heads'], pp['head_dim']
    D = nh * hd
    I = pp['wdown'].shape[0]

    xm_b = x_mod.astype(bf)
    xb_b = x_back.astype(bf)

    fb = jnp.einsum('bsh,hk->bsk', xm_b, pp['fb_wgw'], preferred_element_type=f32)
    delta = jax.nn.sigmoid(fb[..., :H] + pp['fb_bg']) * fb[..., H:]

    dr = jnp.einsum('bsh,hk->bsk', xb_b, pp['dr_wgw'], preferred_element_type=f32)
    drv = jax.nn.sigmoid(dr[..., :H] + pp['dr_bg']) * dr[..., H:]

    qn = _rms(x_mod, pp['cross_ln_w'], CROSS_LN_EPS).astype(bf)
    q = jnp.einsum('bsh,hd->bsd', qn, pp['wq'], preferred_element_type=f32)
    kv = jnp.einsum('bsh,hd->bsd', xb_b, pp['wkv'], preferred_element_type=f32)
    k, v = kv[..., :D], kv[..., D:]
    qh = q.reshape(B, Sq, nh, hd).transpose(0, 2, 1, 3).astype(bf)
    kh = k.reshape(B, Skv, nh, hd).transpose(0, 2, 1, 3).astype(bf)
    vh = v.reshape(B, Skv, nh, hd).transpose(0, 2, 1, 3).astype(bf)
    s = jnp.einsum('bhqd,bhkd->bhqk', qh, kh, preferred_element_type=f32) + mask3[:, None]
    p = jax.nn.softmax(s, axis=-1)
    ctx = jnp.einsum('bhqk,bhkd->bhqd', p.astype(bf), vh, preferred_element_type=f32)
    ctx = ctx.transpose(0, 2, 1, 3).reshape(B, Sq, D).astype(bf)
    mod = jnp.einsum('bsd,dh->bsh', ctx, pp['wo'], preferred_element_type=f32)

    x = x_mod + mod + drv
    h1 = x + _rms(x, pp['ln1'], BLOCK_LN_EPS)
    h2 = _rms(h1, pp['ln2'], BLOCK_LN_EPS).astype(bf)
    gu = jnp.einsum('bsh,hk->bsk', h2, pp['wgu'], preferred_element_type=f32)
    mlp_in = (jax.nn.gelu(gu[..., :I], approximate=True) * gu[..., I:]).astype(bf)
    mlp = jnp.einsum('bsi,ih->bsh', mlp_in, pp['wdown'], preferred_element_type=f32)
    return h1 + mlp, delta


def module_block_ref_f32(rp, x_mod, x_back, mask3):
    """Original-module semantics in full f32 (loose sanity check)."""
    hp = jax.lax.Precision.HIGHEST

    def gh(x, wg, bg, ww):
        return jax.nn.sigmoid(jnp.einsum('bsh,hk->bsk', x, wg, precision=hp) + bg) * \
               jnp.einsum('bsh,hk->bsk', x, ww, precision=hp)

    delta = gh(x_mod, rp['fb_wg'], rp['fb_bg'], rp['fb_ww'])
    drv = gh(x_back, rp['dr_wg'], rp['dr_bg'], rp['dr_ww'])
    qn = _rms(x_mod, rp['cross_ln_w'], CROSS_LN_EPS)
    B, Sq, _ = x_mod.shape
    Skv = x_back.shape[1]
    nh, hd = rp['num_heads'], rp['head_dim']
    q = jnp.einsum('bsh,hd->bsd', qn, rp['wq'], precision=hp).reshape(B, Sq, nh, hd).transpose(0, 2, 1, 3)
    k = jnp.einsum('bsh,hd->bsd', x_back, rp['wk'], precision=hp).reshape(B, Skv, nh, hd).transpose(0, 2, 1, 3)
    v = jnp.einsum('bsh,hd->bsd', x_back, rp['wv'], precision=hp).reshape(B, Skv, nh, hd).transpose(0, 2, 1, 3)
    s = jnp.einsum('bhqd,bhkd->bhqk', q, k, precision=hp) * (hd ** -0.5) + mask3[:, None]
    a = jax.nn.softmax(s, axis=-1)
    ctx = jnp.einsum('bhqk,bhkd->bhqd', a, v, precision=hp).transpose(0, 2, 1, 3).reshape(B, Sq, nh * hd)
    mod = jnp.einsum('bsd,dh->bsh', ctx, rp['wo'], precision=hp)
    x = x_mod + mod + drv
    h1 = x + _rms(x, rp['ln1'], BLOCK_LN_EPS)
    h2 = _rms(h1, rp['ln2'], BLOCK_LN_EPS)
    mlp = jnp.einsum(
        'bsi,ih->bsh',
        jax.nn.gelu(jnp.einsum('bsh,hi->bsi', h2, rp['wgate'], precision=hp), approximate=True)
        * jnp.einsum('bsh,hi->bsi', h2, rp['wup'], precision=hp),
        rp['wdown'], precision=hp)
    return h1 + mlp, delta


# ---------------------------------- main -------------------------------------

if __name__ == "__main__":
    # Small Gemma-like shapes: every matmul output last-dim is a multiple of 128
    # (lane-dense stores) and head_dim = 128 = one lane tile (Gemma-7B structure).
    B, Sq, Skv, H, NH, HD, I = 2, 8, 8, 128, 4, 128, 512
    D = NH * HD
    key = jax.random.PRNGKey(0)
    keys = jax.random.split(key, 20)

    def w(k, shape, scale=0.05):
        return (scale * jax.random.normal(k, shape)).astype(jnp.float32)

    # raw weights in (in, out) orientation; GatedHighway weights are random here
    # (zero-init in torch) so the kernel path is numerically non-trivial.
    raw = dict(
        num_heads=NH, head_dim=HD,
        wq=w(keys[0], (H, D)), wk=w(keys[1], (H, D)),
        wv=w(keys[2], (H, D)), wo=w(keys[3], (D, H)),
        cross_ln_w=(1.0 + w(keys[4], (1, H))).astype(jnp.float32),
        fb_wg=w(keys[5], (H, H)), fb_bg=w(keys[6], (1, H)), fb_ww=w(keys[7], (H, H)),
        dr_wg=w(keys[8], (H, H)), dr_bg=w(keys[9], (1, H)), dr_ww=w(keys[10], (H, H)),
        ln1=(1.0 + w(keys[11], (1, H))).astype(jnp.float32),
        ln2=(1.0 + w(keys[12], (1, H))).astype(jnp.float32),
        wgate=w(keys[13], (H, I)), wup=w(keys[14], (H, I)), wdown=w(keys[15], (I, H)),
    )
    pp = prep_params(raw)

    x_mod = w(keys[16], (B, Sq, H), 1.0)
    x_back = w(keys[17], (B, Skv, H), 1.0)
    causal = jnp.tril(jnp.ones((Sq, Skv), jnp.float32))
    mask = jnp.where(causal > 0, 0.0, -1e9).astype(jnp.float32)
    mask = jnp.broadcast_to(mask[None], (B, Sq, Skv))        # additive, broadcast over heads

    x_out, delta = module_block_forward(pp, x_mod, x_back, mask)
    jax.block_until_ready((x_out, delta))

    # Tight check vs the bf16-consistent reference (same math the kernel implements).
    xr, drf = module_block_ref_prepped(pp, x_mod, x_back, mask)
    np.testing.assert_allclose(np.asarray(delta), np.asarray(drf), rtol=2e-3, atol=2e-3)
    np.testing.assert_allclose(np.asarray(x_out), np.asarray(xr), rtol=1e-2, atol=1e-2)

    # Loose sanity check vs the original f32 module semantics (bf16 rounding slack).
    xf, df = module_block_ref_f32(raw, x_mod, x_back, mask)
    np.testing.assert_allclose(np.asarray(delta), np.asarray(df), rtol=1e-1, atol=1e-1)
    np.testing.assert_allclose(np.asarray(x_out), np.asarray(xf), rtol=1e-1, atol=1e-1)

    print("KERNEL_OK")
</pallas_src>

<mosaic_0001>
module attributes {stable_mosaic.version = 11 : i64} {
  func.func @fused_module_block_kernel(%arg0: memref<16x128xf32, #tpu.memory_space<vmem>>, %arg1: memref<16x128xbf16, #tpu.memory_space<vmem>>, %arg2: memref<2x8x8xf32, #tpu.memory_space<vmem>>, %arg3: memref<128x256xbf16, #tpu.memory_space<vmem>>, %arg4: memref<1x128xf32, #tpu.memory_space<vmem>>, %arg5: memref<128x256xbf16, #tpu.memory_space<vmem>>, %arg6: memref<1x128xf32, #tpu.memory_space<vmem>>, %arg7: memref<1x128xf32, #tpu.memory_space<vmem>>, %arg8: memref<128x512xbf16, #tpu.memory_space<vmem>>, %arg9: memref<128x1024xbf16, #tpu.memory_space<vmem>>, %arg10: memref<512x128xbf16, #tpu.memory_space<vmem>>, %arg11: memref<1x128xf32, #tpu.memory_space<vmem>>, %arg12: memref<1x128xf32, #tpu.memory_space<vmem>>, %arg13: memref<128x1024xbf16, #tpu.memory_space<vmem>>, %arg14: memref<512x128xbf16, #tpu.memory_space<vmem>>, %arg15: memref<16x128xf32, #tpu.memory_space<vmem>>, %arg16: memref<16x128xf32, #tpu.memory_space<vmem>>, %arg17: memref<16x512xf32, #tpu.memory_space<vmem>>) attributes {dimension_semantics = [], scalar_prefetch = 0 : i64, scratch_operands = 1 : i64, tpu.core_type = #tpu.core_type<tc>} {
    %c0 = arith.constant 0 : index
    %c0_0 = arith.constant 0 : index
    %0 = vector.load %arg0[%c0, %c0_0] : memref<16x128xf32, #tpu.memory_space<vmem>>, vector<16x128xf32>
    %c0_1 = arith.constant 0 : index
    %c0_2 = arith.constant 0 : index
    %1 = vector.load %arg1[%c0_1, %c0_2] : memref<16x128xbf16, #tpu.memory_space<vmem>>, vector<16x128xbf16>
    %2 = arith.truncf %0 : vector<16x128xf32> to vector<16x128xbf16>
    %c0_3 = arith.constant 0 : index
    %c0_4 = arith.constant 0 : index
    %3 = vector.load %arg3[%c0_3, %c0_4] : memref<128x256xbf16, #tpu.memory_space<vmem>>, vector<128x256xbf16>
    %cst = arith.constant dense<0.000000e+00> : vector<16x256xf32>
    %4 = tpu.matmul %2, %3, %cst {dimension_numbers = #tpu.dot_dimension_numbers<[1], [0], [0], [1], [0, 0, 1, 1], [], []>} : vector<16x128xbf16>, vector<128x256xbf16>, vector<16x256xf32> -> vector<16x256xf32>
    %5 = vector.extract_strided_slice %4 {offsets = [0, 0], sizes = [16, 128], strides = [1, 1]} : vector<16x256xf32> to vector<16x128xf32>
    %c0_5 = arith.constant 0 : index
    %c0_6 = arith.constant 0 : index
    %6 = vector.load %arg4[%c0_5, %c0_6] : memref<1x128xf32, #tpu.memory_space<vmem>>, vector<1x128xf32>
    %7 = vector.broadcast %6 : vector<1x128xf32> to vector<16x128xf32>
    %8 = arith.addf %5, %7 : vector<16x128xf32>
    %9 = arith.negf %8 : vector<16x128xf32>
    %10 = math.exp %9 : vector<16x128xf32>
    %cst_7 = arith.constant 1.000000e+00 : f32
    %11 = vector.broadcast %cst_7 : f32 to vector<16x128xf32>
    %12 = arith.addf %11, %10 : vector<16x128xf32>
    %13 = arith.divf %11, %12 : vector<16x128xf32>
    %14 = vector.extract_strided_slice %4 {offsets = [0, 128], sizes = [16, 128], strides = [1, 1]} : vector<16x256xf32> to vector<16x128xf32>
    %15 = arith.mulf %13, %14 : vector<16x128xf32>
    %c0_8 = arith.constant 0 : index
    %c0_9 = arith.constant 0 : index
    %16 = vector.load %arg16[%c0_8, %c0_9] : memref<16x128xf32, #tpu.memory_space<vmem>>, vector<16x128xf32>
    tpu.vector_store %arg16[%c0_8, %c0_9], %15 {strides = array<i32>} : memref<16x128xf32, #tpu.memory_space<vmem>>, vector<16x128xf32>,
    %c0_10 = arith.constant 0 : index
    %c0_11 = arith.constant 0 : index
    %17 = vector.load %arg5[%c0_10, %c0_11] : memref<128x256xbf16, #tpu.memory_space<vmem>>, vector<128x256xbf16>
    %cst_12 = arith.constant dense<0.000000e+00> : vector<16x256xf32>
    %18 = tpu.matmul %1, %17, %cst_12 {dimension_numbers = #tpu.dot_dimension_numbers<[1], [0], [0], [1], [0, 0, 1, 1], [], []>} : vector<16x128xbf16>, vector<128x256xbf16>, vector<16x256xf32> -> vector<16x256xf32>
    %19 = vector.extract_strided_slice %18 {offsets = [0, 0], sizes = [16, 128], strides = [1, 1]} : vector<16x256xf32> to vector<16x128xf32>
    %c0_13 = arith.constant 0 : index
    %c0_14 = arith.constant 0 : index
    %20 = vector.load %arg6[%c0_13, %c0_14] : memref<1x128xf32, #tpu.memory_space<vmem>>, vector<1x128xf32>
    %21 = vector.broadcast %20 : vector<1x128xf32> to vector<16x128xf32>
    %22 = arith.addf %19, %21 : vector<16x128xf32>
    %23 = arith.negf %22 : vector<16x128xf32>
    %24 = math.exp %23 : vector<16x128xf32>
    %cst_15 = arith.constant 1.000000e+00 : f32
    %25 = vector.broadcast %cst_15 : f32 to vector<16x128xf32>
    %26 = arith.addf %25, %24 : vector<16x128xf32>
    %27 = arith.divf %25, %26 : vector<16x128xf32>
    %28 = vector.extract_strided_slice %18 {offsets = [0, 128], sizes = [16, 128], strides = [1, 1]} : vector<16x256xf32> to vector<16x128xf32>
    %29 = arith.mulf %27, %28 : vector<16x128xf32>
    %c0_16 = arith.constant 0 : index
    %c0_17 = arith.constant 0 : index
    %30 = vector.load %arg7[%c0_16, %c0_17] : memref<1x128xf32, #tpu.memory_space<vmem>>, vector<1x128xf32>
    %31 = arith.mulf %0, %0 : vector<16x128xf32>
    %cst_18 = arith.constant dense<0.000000e+00> : vector<16xf32>
    %32 = vector.multi_reduction <add>, %31, %cst_18 [1] : vector<16x128xf32> to vector<16xf32>
    %33 = vector.shape_cast %32 : vector<16xf32> to vector<16x1xf32>
    %cst_19 = arith.constant 1.280000e+02 : f32
    %34 = vector.broadcast %cst_19 : f32 to vector<16x1xf32>
    %35 = arith.divf %33, %34 : vector<16x1xf32>
    %cst_20 = arith.constant 9.99999974E-6 : f32
    %36 = vector.broadcast %cst_20 : f32 to vector<16x1xf32>
    %37 = arith.addf %35, %36 : vector<16x1xf32>
    %38 = math.rsqrt %37 : vector<16x1xf32>
    %39 = vector.broadcast %38 : vector<16x1xf32> to vector<16x128xf32>
    %40 = arith.mulf %0, %39 : vector<16x128xf32>
    %41 = vector.broadcast %30 : vector<1x128xf32> to vector<16x128xf32>
    %42 = arith.mulf %40, %41 : vector<16x128xf32>
    %43 = arith.truncf %42 : vector<16x128xf32> to vector<16x128xbf16>
    %c0_21 = arith.constant 0 : index
    %c0_22 = arith.constant 0 : index
    %44 = vector.load %arg8[%c0_21, %c0_22] : memref<128x512xbf16, #tpu.memory_space<vmem>>, vector<128x512xbf16>
    %cst_23 = arith.constant dense<0.000000e+00> : vector<16x512xf32>
    %45 = tpu.matmul %43, %44, %cst_23 {dimension_numbers = #tpu.dot_dimension_numbers<[1], [0], [0], [1], [0, 0, 1, 1], [], []>} : vector<16x128xbf16>, vector<128x512xbf16>, vector<16x512xf32> -> vector<16x512xf32>
    %c0_24 = arith.constant 0 : index
    %c0_25 = arith.constant 0 : index
    %46 = vector.load %arg9[%c0_24, %c0_25] : memref<128x1024xbf16, #tpu.memory_space<vmem>>, vector<128x1024xbf16>
    %cst_26 = arith.constant dense<0.000000e+00> : vector<16x1024xf32>
    %47 = tpu.matmul %1, %46, %cst_26 {dimension_numbers = #tpu.dot_dimension_numbers<[1], [0], [0], [1], [0, 0, 1, 1], [], []>} : vector<16x128xbf16>, vector<128x1024xbf16>, vector<16x1024xf32> -> vector<16x1024xf32>
    %c0_27 = arith.constant 0 : index
    %c0_28 = arith.constant 0 : index
    %c0_29 = arith.constant 0 : index
    %48 = vector.load %arg2[%c0_27, %c0_28, %c0_29] : memref<2x8x8xf32, #tpu.memory_space<vmem>>, vector<1x8x8xf32>
    %49 = vector.shape_cast %48 : vector<1x8x8xf32> to vector<8x8xf32>
    %50 = vector.extract_strided_slice %45 {offsets = [0, 0], sizes = [8, 128], strides = [1, 1]} : vector<16x512xf32> to vector<8x128xf32>
    %51 = arith.truncf %50 : vector<8x128xf32> to vector<8x128xbf16>
    %52 = vector.extract_strided_slice %47 {offsets = [0, 0], sizes = [8, 128], strides = [1, 1]} : vector<16x1024xf32> to vector<8x128xf32>
    %53 = arith.truncf %52 : vector<8x128xf32> to vector<8x128xbf16>
    %54 = vector.extract_strided_slice %47 {offsets = [0, 512], sizes = [8, 128], strides = [1, 1]} : vector<16x1024xf32> to vector<8x128xf32>
    %55 = arith.truncf %54 : vector<8x128xf32> to vector<8x128xbf16>
    "tpu.trace_start"() <{level = 10 : i32, message = "qd,kd->qk"}> : () -> ()
    %cst_30 = arith.constant dense<0.000000e+00> : vector<8x8xf32>
    %56 = tpu.matmul %51, %53, %cst_30 {dimension_numbers = #tpu.dot_dimension_numbers<[1], [1], [0], [0], [0, 0, 1, 0], [], []>} : vector<8x128xbf16>, vector<8x128xbf16>, vector<8x8xf32> -> vector<8x8xf32>
    "tpu.trace_stop"() : () -> ()
    %57 = arith.addf %56, %49 : vector<8x8xf32>
    %cst_31 = arith.constant dense<0xFF800000> : vector<8xf32>
    %58 = vector.multi_reduction <maximumf>, %57, %cst_31 [1] : vector<8x8xf32> to vector<8xf32>
    %59 = vector.shape_cast %58 : vector<8xf32> to vector<8x1xf32>
    %60 = vector.broadcast %59 : vector<8x1xf32> to vector<8x8xf32>
    %61 = arith.subf %57, %60 : vector<8x8xf32>
    %62 = math.exp %61 : vector<8x8xf32>
    %cst_32 = arith.constant dense<0.000000e+00> : vector<8xf32>
    %63 = vector.multi_reduction <add>, %62, %cst_32 [1] : vector<8x8xf32> to vector<8xf32>
    %64 = vector.shape_cast %63 : vector<8xf32> to vector<8x1xf32>
    %65 = tpu.reciprocal %64 {approx = true} : vector<8x1xf32> -> vector<8x1xf32>
    %66 = vector.broadcast %65 : vector<8x1xf32> to vector<8x8xf32>
    %67 = arith.mulf %62, %66 : vector<8x8xf32>
    %68 = arith.truncf %67 : vector<8x8xf32> to vector<8x8xbf16>
    %cst_33 = arith.constant dense<0.000000e+00> : vector<8x128xf32>
    %69 = tpu.matmul %68, %55, %cst_33 {dimension_numbers = #tpu.dot_dimension_numbers<[1], [0], [0], [1], [0, 0, 1, 1], [], []>} : vector<8x8xbf16>, vector<8x128xbf16>, vector<8x128xf32> -> vector<8x128xf32>
    %c0_34 = arith.constant 0 : index
    %c0_35 = arith.constant 0 : index
    %70 = vector.load %arg17[%c0_34, %c0_35] : memref<16x512xf32, #tpu.memory_space<vmem>>, vector<8x128xf32>
    tpu.vector_store %arg17[%c0_34, %c0_35], %69 {strides = array<i32>} : memref<16x512xf32, #tpu.memory_space<vmem>>, vector<8x128xf32>,
    %71 = vector.extract_strided_slice %45 {offsets = [0, 128], sizes = [8, 128], strides = [1, 1]} : vector<16x512xf32> to vector<8x128xf32>
    %72 = arith.truncf %71 : vector<8x128xf32> to vector<8x128xbf16>
    %73 = vector.extract_strided_slice %47 {offsets = [0, 128], sizes = [8, 128], strides = [1, 1]} : vector<16x1024xf32> to vector<8x128xf32>
    %74 = arith.truncf %73 : vector<8x128xf32> to vector<8x128xbf16>
    %75 = vector.extract_strided_slice %47 {offsets = [0, 640], sizes = [8, 128], strides = [1, 1]} : vector<16x1024xf32> to vector<8x128xf32>
    %76 = arith.truncf %75 : vector<8x128xf32> to vector<8x128xbf16>
    "tpu.trace_start"() <{level = 10 : i32, message = "qd,kd->qk"}> : () -> ()
    %cst_36 = arith.constant dense<0.000000e+00> : vector<8x8xf32>
    %77 = tpu.matmul %72, %74, %cst_36 {dimension_numbers = #tpu.dot_dimension_numbers<[1], [1], [0], [0], [0, 0, 1, 0], [], []>} : vector<8x128xbf16>, vector<8x128xbf16>, vector<8x8xf32> -> vector<8x8xf32>
    "tpu.trace_stop"() : () -> ()
    %78 = arith.addf %77, %49 : vector<8x8xf32>
    %cst_37 = arith.constant dense<0xFF800000> : vector<8xf32>
    %79 = vector.multi_reduction <maximumf>, %78, %cst_37 [1] : vector<8x8xf32> to vector<8xf32>
    %80 = vector.shape_cast %79 : vector<8xf32> to vector<8x1xf32>
    %81 = vector.broadcast %80 : vector<8x1xf32> to vector<8x8xf32>
    %82 = arith.subf %78, %81 : vector<8x8xf32>
    %83 = math.exp %82 : vector<8x8xf32>
    %cst_38 = arith.constant dense<0.000000e+00> : vector<8xf32>
    %84 = vector.multi_reduction <add>, %83, %cst_38 [1] : vector<8x8xf32> to vector<8xf32>
    %85 = vector.shape_cast %84 : vector<8xf32> to vector<8x1xf32>
    %86 = tpu.reciprocal %85 {approx = true} : vector<8x1xf32> -> vector<8x1xf32>
    %87 = vector.broadcast %86 : vector<8x1xf32> to vector<8x8xf32>
    %88 = arith.mulf %83, %87 : vector<8x8xf32>
    %89 = arith.truncf %88 : vector<8x8xf32> to vector<8x8xbf16>
    %cst_39 = arith.constant dense<0.000000e+00> : vector<8x128xf32>
    %90 = tpu.matmul %89, %76, %cst_39 {dimension_numbers = #tpu.dot_dimension_numbers<[1], [0], [0], [1], [0, 0, 1, 1], [], []>} : vector<8x8xbf16>, vector<8x128xbf16>, vector<8x128xf32> -> vector<8x128xf32>
    %c0_40 = arith.constant 0 : index
    %c128 = arith.constant 128 : index
    %91 = vector.load %arg17[%c0_40, %c128] : memref<16x512xf32, #tpu.memory_space<vmem>>, vector<8x128xf32>
    tpu.vector_store %arg17[%c0_40, %c128], %90 {strides = array<i32>} : memref<16x512xf32, #tpu.memory_space<vmem>>, vector<8x128xf32>,
    %92 = vector.extract_strided_slice %45 {offsets = [0, 256], sizes = [8, 128], strides = [1, 1]} : vector<16x512xf32> to vector<8x128xf32>
    %93 = arith.truncf %92 : vector<8x128xf32> to vector<8x128xbf16>
    %94 = vector.extract_strided_slice %47 {offsets = [0, 256], sizes = [8, 128], strides = [1, 1]} : vector<16x1024xf32> to vector<8x128xf32>
    %95 = arith.truncf %94 : vector<8x128xf32> to vector<8x128xbf16>
    %96 = vector.extract_strided_slice %47 {offsets = [0, 768], sizes = [8, 128], strides = [1, 1]} : vector<16x1024xf32> to vector<8x128xf32>
    %97 = arith.truncf %96 : vector<8x128xf32> to vector<8x128xbf16>
    "tpu.trace_start"() <{level = 10 : i32, message = "qd,kd->qk"}> : () -> ()
    %cst_41 = arith.constant dense<0.000000e+00> : vector<8x8xf32>
    %98 = tpu.matmul %93, %95, %cst_41 {dimension_numbers = #tpu.dot_dimension_numbers<[1], [1], [0], [0], [0, 0, 1, 0], [], []>} : vector<8x128xbf16>, vector<8x128xbf16>, vector<8x8xf32> -> vector<8x8xf32>
    "tpu.trace_stop"() : () -> ()
    %99 = arith.addf %98, %49 : vector<8x8xf32>
    %cst_42 = arith.constant dense<0xFF800000> : vector<8xf32>
    %100 = vector.multi_reduction <maximumf>, %99, %cst_42 [1] : vector<8x8xf32> to vector<8xf32>
    %101 = vector.shape_cast %100 : vector<8xf32> to vector<8x1xf32>
    %102 = vector.broadcast %101 : vector<8x1xf32> to vector<8x8xf32>
    %103 = arith.subf %99, %102 : vector<8x8xf32>
    %104 = math.exp %103 : vector<8x8xf32>
    %cst_43 = arith.constant dense<0.000000e+00> : vector<8xf32>
    %105 = vector.multi_reduction <add>, %104, %cst_43 [1] : vector<8x8xf32> to vector<8xf32>
    %106 = vector.shape_cast %105 : vector<8xf32> to vector<8x1xf32>
    %107 = tpu.reciprocal %106 {approx = true} : vector<8x1xf32> -> vector<8x1xf32>
    %108 = vector.broadcast %107 : vector<8x1xf32> to vector<8x8xf32>
    %109 = arith.mulf %104, %108 : vector<8x8xf32>
    %110 = arith.truncf %109 : vector<8x8xf32> to vector<8x8xbf16>
    %cst_44 = arith.constant dense<0.000000e+00> : vector<8x128xf32>
    %111 = tpu.matmul %110, %97, %cst_44 {dimension_numbers = #tpu.dot_dimension_numbers<[1], [0], [0], [1], [0, 0, 1, 1], [], []>} : vector<8x8xbf16>, vector<8x128xbf16>, vector<8x128xf32> -> vector<8x128xf32>
    %c0_45 = arith.constant 0 : index
    %c256 = arith.constant 256 : index
    %112 = vector.load %arg17[%c0_45, %c256] : memref<16x512xf32, #tpu.memory_space<vmem>>, vector<8x128xf32>
    tpu.vector_store %arg17[%c0_45, %c256], %111 {strides = array<i32>} : memref<16x512xf32, #tpu.memory_space<vmem>>, vector<8x128xf32>,
    %113 = vector.extract_strided_slice %45 {offsets = [0, 384], sizes = [8, 128], strides = [1, 1]} : vector<16x512xf32> to vector<8x128xf32>
    %114 = arith.truncf %113 : vector<8x128xf32> to vector<8x128xbf16>
    %115 = vector.extract_strided_slice %47 {offsets = [0, 384], sizes = [8, 128], strides = [1, 1]} : vector<16x1024xf32> to vector<8x128xf32>
    %116 = arith.truncf %115 : vector<8x128xf32> to vector<8x128xbf16>
    %117 = vector.extract_strided_slice %47 {offsets = [0, 896], sizes = [8, 128], strides = [1, 1]} : vector<16x1024xf32> to vector<8x128xf32>
    %118 = arith.truncf %117 : vector<8x128xf32> to vector<8x128xbf16>
    "tpu.trace_start"() <{level = 10 : i32, message = "qd,kd->qk"}> : () -> ()
    %cst_46 = arith.constant dense<0.000000e+00> : vector<8x8xf32>
    %119 = tpu.matmul %114, %116, %cst_46 {dimension_numbers = #tpu.dot_dimension_numbers<[1], [1], [0], [0], [0, 0, 1, 0], [], []>} : vector<8x128xbf16>, vector<8x128xbf16>, vector<8x8xf32> -> vector<8x8xf32>
    "tpu.trace_stop"() : () -> ()
    %120 = arith.addf %119, %49 : vector<8x8xf32>
    %cst_47 = arith.constant dense<0xFF800000> : vector<8xf32>
    %121 = vector.multi_reduction <maximumf>, %120, %cst_47 [1] : vector<8x8xf32> to vector<8xf32>
    %122 = vector.shape_cast %121 : vector<8xf32> to vector<8x1xf32>
    %123 = vector.broadcast %122 : vector<8x1xf32> to vector<8x8xf32>
    %124 = arith.subf %120, %123 : vector<8x8xf32>
    %125 = math.exp %124 : vector<8x8xf32>
    %cst_48 = arith.constant dense<0.000000e+00> : vector<8xf32>
    %126 = vector.multi_reduction <add>, %125, %cst_48 [1] : vector<8x8xf32> to vector<8xf32>
    %127 = vector.shape_cast %126 : vector<8xf32> to vector<8x1xf32>
    %128 = tpu.reciprocal %127 {approx = true} : vector<8x1xf32> -> vector<8x1xf32>
    %129 = vector.broadcast %128 : vector<8x1xf32> to vector<8x8xf32>
    %130 = arith.mulf %125, %129 : vector<8x8xf32>
    %131 = arith.truncf %130 : vector<8x8xf32> to vector<8x8xbf16>
    %cst_49 = arith.constant dense<0.000000e+00> : vector<8x128xf32>
    %132 = tpu.matmul %131, %118, %cst_49 {dimension_numbers = #tpu.dot_dimension_numbers<[1], [0], [0], [1], [0, 0, 1, 1], [], []>} : vector<8x8xbf16>, vector<8x128xbf16>, vector<8x128xf32> -> vector<8x128xf32>
    %c0_50 = arith.constant 0 : index
    %c384 = arith.constant 384 : index
    %133 = vector.load %arg17[%c0_50, %c384] : memref<16x512xf32, #tpu.memory_space<vmem>>, vector<8x128xf32>
    tpu.vector_store %arg17[%c0_50, %c384], %132 {strides = array<i32>} : memref<16x512xf32, #tpu.memory_space<vmem>>, vector<8x128xf32>,
    %c1 = arith.constant 1 : index
    %c0_51 = arith.constant 0 : index
    %c0_52 = arith.constant 0 : index
    %134 = vector.load %arg2[%c1, %c0_51, %c0_52] : memref<2x8x8xf32, #tpu.memory_space<vmem>>, vector<1x8x8xf32>
    %135 = vector.shape_cast %134 : vector<1x8x8xf32> to vector<8x8xf32>
    %136 = vector.extract_strided_slice %45 {offsets = [8, 0], sizes = [8, 128], strides = [1, 1]} : vector<16x512xf32> to vector<8x128xf32>
    %137 = arith.truncf %136 : vector<8x128xf32> to vector<8x128xbf16>
    %138 = vector.extract_strided_slice %47 {offsets = [8, 0], sizes = [8, 128], strides = [1, 1]} : vector<16x1024xf32> to vector<8x128xf32>
    %139 = arith.truncf %138 : vector<8x128xf32> to vector<8x128xbf16>
    %140 = vector.extract_strided_slice %47 {offsets = [8, 512], sizes = [8, 128], strides = [1, 1]} : vector<16x1024xf32> to vector<8x128xf32>
    %141 = arith.truncf %140 : vector<8x128xf32> to vector<8x128xbf16>
    "tpu.trace_start"() <{level = 10 : i32, message = "qd,kd->qk"}> : () -> ()
    %cst_53 = arith.constant dense<0.000000e+00> : vector<8x8xf32>
    %142 = tpu.matmul %137, %139, %cst_53 {dimension_numbers = #tpu.dot_dimension_numbers<[1], [1], [0], [0], [0, 0, 1, 0], [], []>} : vector<8x128xbf16>, vector<8x128xbf16>, vector<8x8xf32> -> vector<8x8xf32>
    "tpu.trace_stop"() : () -> ()
    %143 = arith.addf %142, %135 : vector<8x8xf32>
    %cst_54 = arith.constant dense<0xFF800000> : vector<8xf32>
    %144 = vector.multi_reduction <maximumf>, %143, %cst_54 [1] : vector<8x8xf32> to vector<8xf32>
    %145 = vector.shape_cast %144 : vector<8xf32> to vector<8x1xf32>
    %146 = vector.broadcast %145 : vector<8x1xf32> to vector<8x8xf32>
    %147 = arith.subf %143, %146 : vector<8x8xf32>
    %148 = math.exp %147 : vector<8x8xf32>
    %cst_55 = arith.constant dense<0.000000e+00> : vector<8xf32>
    %149 = vector.multi_reduction <add>, %148, %cst_55 [1] : vector<8x8xf32> to vector<8xf32>
    %150 = vector.shape_cast %149 : vector<8xf32> to vector<8x1xf32>
    %151 = tpu.reciprocal %150 {approx = true} : vector<8x1xf32> -> vector<8x1xf32>
    %152 = vector.broadcast %151 : vector<8x1xf32> to vector<8x8xf32>
    %153 = arith.mulf %148, %152 : vector<8x8xf32>
    %154 = arith.truncf %153 : vector<8x8xf32> to vector<8x8xbf16>
    %cst_56 = arith.constant dense<0.000000e+00> : vector<8x128xf32>
    %155 = tpu.matmul %154, %141, %cst_56 {dimension_numbers = #tpu.dot_dimension_numbers<[1], [0], [0], [1], [0, 0, 1, 1], [], []>} : vector<8x8xbf16>, vector<8x128xbf16>, vector<8x128xf32> -> vector<8x128xf32>
    %c8 = arith.constant 8 : index
    %c0_57 = arith.constant 0 : index
    %156 = vector.load %arg17[%c8, %c0_57] : memref<16x512xf32, #tpu.memory_space<vmem>>, vector<8x128xf32>
    tpu.vector_store %arg17[%c8, %c0_57], %155 {strides = array<i32>} : memref<16x512xf32, #tpu.memory_space<vmem>>, vector<8x128xf32>,
    %157 = vector.extract_strided_slice %45 {offsets = [8, 128], sizes = [8, 128], strides = [1, 1]} : vector<16x512xf32> to vector<8x128xf32>
    %158 = arith.truncf %157 : vector<8x128xf32> to vector<8x128xbf16>
    %159 = vector.extract_strided_slice %47 {offsets = [8, 128], sizes = [8, 128], strides = [1, 1]} : vector<16x1024xf32> to vector<8x128xf32>
    %160 = arith.truncf %159 : vector<8x128xf32> to vector<8x128xbf16>
    %161 = vector.extract_strided_slice %47 {offsets = [8, 640], sizes = [8, 128], strides = [1, 1]} : vector<16x1024xf32> to vector<8x128xf32>
    %162 = arith.truncf %161 : vector<8x128xf32> to vector<8x128xbf16>
    "tpu.trace_start"() <{level = 10 : i32, message = "qd,kd->qk"}> : () -> ()
    %cst_58 = arith.constant dense<0.000000e+00> : vector<8x8xf32>
    %163 = tpu.matmul %158, %160, %cst_58 {dimension_numbers = #tpu.dot_dimension_numbers<[1], [1], [0], [0], [0, 0, 1, 0], [], []>} : vector<8x128xbf16>, vector<8x128xbf16>, vector<8x8xf32> -> vector<8x8xf32>
    "tpu.trace_stop"() : () -> ()
    %164 = arith.addf %163, %135 : vector<8x8xf32>
    %cst_59 = arith.constant dense<0xFF800000> : vector<8xf32>
    %165 = vector.multi_reduction <maximumf>, %164, %cst_59 [1] : vector<8x8xf32> to vector<8xf32>
    %166 = vector.shape_cast %165 : vector<8xf32> to vector<8x1xf32>
    %167 = vector.broadcast %166 : vector<8x1xf32> to vector<8x8xf32>
    %168 = arith.subf %164, %167 : vector<8x8xf32>
    %169 = math.exp %168 : vector<8x8xf32>
    %cst_60 = arith.constant dense<0.000000e+00> : vector<8xf32>
    %170 = vector.multi_reduction <add>, %169, %cst_60 [1] : vector<8x8xf32> to vector<8xf32>
    %171 = vector.shape_cast %170 : vector<8xf32> to vector<8x1xf32>
    %172 = tpu.reciprocal %171 {approx = true} : vector<8x1xf32> -> vector<8x1xf32>
    %173 = vector.broadcast %172 : vector<8x1xf32> to vector<8x8xf32>
    %174 = arith.mulf %169, %173 : vector<8x8xf32>
    %175 = arith.truncf %174 : vector<8x8xf32> to vector<8x8xbf16>
    %cst_61 = arith.constant dense<0.000000e+00> : vector<8x128xf32>
    %176 = tpu.matmul %175, %162, %cst_61 {dimension_numbers = #tpu.dot_dimension_numbers<[1], [0], [0], [1], [0, 0, 1, 1], [], []>} : vector<8x8xbf16>, vector<8x128xbf16>, vector<8x128xf32> -> vector<8x128xf32>
    %c8_62 = arith.constant 8 : index
    %c128_63 = arith.constant 128 : index
    %177 = vector.load %arg17[%c8_62, %c128_63] : memref<16x512xf32, #tpu.memory_space<vmem>>, vector<8x128xf32>
    tpu.vector_store %arg17[%c8_62, %c128_63], %176 {strides = array<i32>} : memref<16x512xf32, #tpu.memory_space<vmem>>, vector<8x128xf32>,
    %178 = vector.extract_strided_slice %45 {offsets = [8, 256], sizes = [8, 128], strides = [1, 1]} : vector<16x512xf32> to vector<8x128xf32>
    %179 = arith.truncf %178 : vector<8x128xf32> to vector<8x128xbf16>
    %180 = vector.extract_strided_slice %47 {offsets = [8, 256], sizes = [8, 128], strides = [1, 1]} : vector<16x1024xf32> to vector<8x128xf32>
    %181 = arith.truncf %180 : vector<8x128xf32> to vector<8x128xbf16>
    %182 = vector.extract_strided_slice %47 {offsets = [8, 768], sizes = [8, 128], strides = [1, 1]} : vector<16x1024xf32> to vector<8x128xf32>
    %183 = arith.truncf %182 : vector<8x128xf32> to vector<8x128xbf16>
    "tpu.trace_start"() <{level = 10 : i32, message = "qd,kd->qk"}> : () -> ()
    %cst_64 = arith.constant dense<0.000000e+00> : vector<8x8xf32>
    %184 = tpu.matmul %179, %181, %cst_64 {dimension_numbers = #tpu.dot_dimension_numbers<[1], [1], [0], [0], [0, 0, 1, 0], [], []>} : vector<8x128xbf16>, vector<8x128xbf16>, vector<8x8xf32> -> vector<8x8xf32>
    "tpu.trace_stop"() : () -> ()
    %185 = arith.addf %184, %135 : vector<8x8xf32>
    %cst_65 = arith.constant dense<0xFF800000> : vector<8xf32>
    %186 = vector.multi_reduction <maximumf>, %185, %cst_65 [1] : vector<8x8xf32> to vector<8xf32>
    %187 = vector.shape_cast %186 : vector<8xf32> to vector<8x1xf32>
    %188 = vector.broadcast %187 : vector<8x1xf32> to vector<8x8xf32>
    %189 = arith.subf %185, %188 : vector<8x8xf32>
    %190 = math.exp %189 : vector<8x8xf32>
    %cst_66 = arith.constant dense<0.000000e+00> : vector<8xf32>
    %191 = vector.multi_reduction <add>, %190, %cst_66 [1] : vector<8x8xf32> to vector<8xf32>
    %192 = vector.shape_cast %191 : vector<8xf32> to vector<8x1xf32>
    %193 = tpu.reciprocal %192 {approx = true} : vector<8x1xf32> -> vector<8x1xf32>
    %194 = vector.broadcast %193 : vector<8x1xf32> to vector<8x8xf32>
    %195 = arith.mulf %190, %194 : vector<8x8xf32>
    %196 = arith.truncf %195 : vector<8x8xf32> to vector<8x8xbf16>
    %cst_67 = arith.constant dense<0.000000e+00> : vector<8x128xf32>
    %197 = tpu.matmul %196, %183, %cst_67 {dimension_numbers = #tpu.dot_dimension_numbers<[1], [0], [0], [1], [0, 0, 1, 1], [], []>} : vector<8x8xbf16>, vector<8x128xbf16>, vector<8x128xf32> -> vector<8x128xf32>
    %c8_68 = arith.constant 8 : index
    %c256_69 = arith.constant 256 : index
    %198 = vector.load %arg17[%c8_68, %c256_69] : memref<16x512xf32, #tpu.memory_space<vmem>>, vector<8x128xf32>
    tpu.vector_store %arg17[%c8_68, %c256_69], %197 {strides = array<i32>} : memref<16x512xf32, #tpu.memory_space<vmem>>, vector<8x128xf32>,
    %199 = vector.extract_strided_slice %45 {offsets = [8, 384], sizes = [8, 128], strides = [1, 1]} : vector<16x512xf32> to vector<8x128xf32>
    %200 = arith.truncf %199 : vector<8x128xf32> to vector<8x128xbf16>
    %201 = vector.extract_strided_slice %47 {offsets = [8, 384], sizes = [8, 128], strides = [1, 1]} : vector<16x1024xf32> to vector<8x128xf32>
    %202 = arith.truncf %201 : vector<8x128xf32> to vector<8x128xbf16>
    %203 = vector.extract_strided_slice %47 {offsets = [8, 896], sizes = [8, 128], strides = [1, 1]} : vector<16x1024xf32> to vector<8x128xf32>
    %204 = arith.truncf %203 : vector<8x128xf32> to vector<8x128xbf16>
    "tpu.trace_start"() <{level = 10 : i32, message = "qd,kd->qk"}> : () -> ()
    %cst_70 = arith.constant dense<0.000000e+00> : vector<8x8xf32>
    %205 = tpu.matmul %200, %202, %cst_70 {dimension_numbers = #tpu.dot_dimension_numbers<[1], [1], [0], [0], [0, 0, 1, 0], [], []>} : vector<8x128xbf16>, vector<8x128xbf16>, vector<8x8xf32> -> vector<8x8xf32>
    "tpu.trace_stop"() : () -> ()
    %206 = arith.addf %205, %135 : vector<8x8xf32>
    %cst_71 = arith.constant dense<0xFF800000> : vector<8xf32>
    %207 = vector.multi_reduction <maximumf>, %206, %cst_71 [1] : vector<8x8xf32> to vector<8xf32>
    %208 = vector.shape_cast %207 : vector<8xf32> to vector<8x1xf32>
    %209 = vector.broadcast %208 : vector<8x1xf32> to vector<8x8xf32>
    %210 = arith.subf %206, %209 : vector<8x8xf32>
    %211 = math.exp %210 : vector<8x8xf32>
    %cst_72 = arith.constant dense<0.000000e+00> : vector<8xf32>
    %212 = vector.multi_reduction <add>, %211, %cst_72 [1] : vector<8x8xf32> to vector<8xf32>
    %213 = vector.shape_cast %212 : vector<8xf32> to vector<8x1xf32>
    %214 = tpu.reciprocal %213 {approx = true} : vector<8x1xf32> -> vector<8x1xf32>
    %215 = vector.broadcast %214 : vector<8x1xf32> to vector<8x8xf32>
    %216 = arith.mulf %211, %215 : vector<8x8xf32>
    %217 = arith.truncf %216 : vector<8x8xf32> to vector<8x8xbf16>
    %cst_73 = arith.constant dense<0.000000e+00> : vector<8x128xf32>
    %218 = tpu.matmul %217, %204, %cst_73 {dimension_numbers = #tpu.dot_dimension_numbers<[1], [0], [0], [1], [0, 0, 1, 1], [], []>} : vector<8x8xbf16>, vector<8x128xbf16>, vector<8x128xf32> -> vector<8x128xf32>
    %c8_74 = arith.constant 8 : index
    %c384_75 = arith.constant 384 : index
    %219 = vector.load %arg17[%c8_74, %c384_75] : memref<16x512xf32, #tpu.memory_space<vmem>>, vector<8x128xf32>
    tpu.vector_store %arg17[%c8_74, %c384_75], %218 {strides = array<i32>} : memref<16x512xf32, #tpu.memory_space<vmem>>, vector<8x128xf32>,
    %c0_76 = arith.constant 0 : index
    %c0_77 = arith.constant 0 : index
    %220 = vector.load %arg17[%c0_76, %c0_77] : memref<16x512xf32, #tpu.memory_space<vmem>>, vector<16x512xf32>
    %221 = arith.truncf %220 : vector<16x512xf32> to vector<16x512xbf16>
    %c0_78 = arith.constant 0 : index
    %c0_79 = arith.constant 0 : index
    %222 = vector.load %arg10[%c0_78, %c0_79] : memref<512x128xbf16, #tpu.memory_space<vmem>>, vector<512x128xbf16>
    %cst_80 = arith.constant dense<0.000000e+00> : vector<16x128xf32>
    %223 = tpu.matmul %221, %222, %cst_80 {dimension_numbers = #tpu.dot_dimension_numbers<[1], [0], [0], [1], [0, 0, 1, 1], [], []>} : vector<16x512xbf16>, vector<512x128xbf16>, vector<16x128xf32> -> vector<16x128xf32>
    %224 = arith.addf %0, %223 : vector<16x128xf32>
    %225 = arith.addf %224, %29 : vector<16x128xf32>
    %c0_81 = arith.constant 0 : index
    %c0_82 = arith.constant 0 : index
    %226 = vector.load %arg11[%c0_81, %c0_82] : memref<1x128xf32, #tpu.memory_space<vmem>>, vector<1x128xf32>
    %227 = arith.mulf %225, %225 : vector<16x128xf32>
    %cst_83 = arith.constant dense<0.000000e+00> : vector<16xf32>
    %228 = vector.multi_reduction <add>, %227, %cst_83 [1] : vector<16x128xf32> to vector<16xf32>
    %229 = vector.shape_cast %228 : vector<16xf32> to vector<16x1xf32>
    %cst_84 = arith.constant 1.280000e+02 : f32
    %230 = vector.broadcast %cst_84 : f32 to vector<16x1xf32>
    %231 = arith.divf %229, %230 : vector<16x1xf32>
    %cst_85 = arith.constant 9.99999997E-7 : f32
    %232 = vector.broadcast %cst_85 : f32 to vector<16x1xf32>
    %233 = arith.addf %231, %232 : vector<16x1xf32>
    %234 = math.rsqrt %233 : vector<16x1xf32>
    %235 = vector.broadcast %234 : vector<16x1xf32> to vector<16x128xf32>
    %236 = arith.mulf %225, %235 : vector<16x128xf32>
    %237 = vector.broadcast %226 : vector<1x128xf32> to vector<16x128xf32>
    %238 = arith.mulf %236, %237 : vector<16x128xf32>
    %239 = arith.addf %225, %238 : vector<16x128xf32>
    %c0_86 = arith.constant 0 : index
    %c0_87 = arith.constant 0 : index
    %240 = vector.load %arg12[%c0_86, %c0_87] : memref<1x128xf32, #tpu.memory_space<vmem>>, vector<1x128xf32>
    %241 = arith.mulf %239, %239 : vector<16x128xf32>
    %cst_88 = arith.constant dense<0.000000e+00> : vector<16xf32>
    %242 = vector.multi_reduction <add>, %241, %cst_88 [1] : vector<16x128xf32> to vector<16xf32>
    %243 = vector.shape_cast %242 : vector<16xf32> to vector<16x1xf32>
    %cst_89 = arith.constant 1.280000e+02 : f32
    %244 = vector.broadcast %cst_89 : f32 to vector<16x1xf32>
    %245 = arith.divf %243, %244 : vector<16x1xf32>
    %cst_90 = arith.constant 9.99999997E-7 : f32
    %246 = vector.broadcast %cst_90 : f32 to vector<16x1xf32>
    %247 = arith.addf %245, %246 : vector<16x1xf32>
    %248 = math.rsqrt %247 : vector<16x1xf32>
    %249 = vector.broadcast %248 : vector<16x1xf32> to vector<16x128xf32>
    %250 = arith.mulf %239, %249 : vector<16x128xf32>
    %251 = vector.broadcast %240 : vector<1x128xf32> to vector<16x128xf32>
    %252 = arith.mulf %250, %251 : vector<16x128xf32>
    %253 = arith.truncf %252 : vector<16x128xf32> to vector<16x128xbf16>
    %c0_91 = arith.constant 0 : index
    %c0_92 = arith.constant 0 : index
    %254 = vector.load %arg13[%c0_91, %c0_92] : memref<128x1024xbf16, #tpu.memory_space<vmem>>, vector<128x1024xbf16>
    %cst_93 = arith.constant dense<0.000000e+00> : vector<16x1024xf32>
    %255 = tpu.matmul %253, %254, %cst_93 {dimension_numbers = #tpu.dot_dimension_numbers<[1], [0], [0], [1], [0, 0, 1, 1], [], []>} : vector<16x128xbf16>, vector<128x1024xbf16>, vector<16x1024xf32> -> vector<16x1024xf32>
    %256 = vector.extract_strided_slice %255 {offsets = [0, 0], sizes = [16, 512], strides = [1, 1]} : vector<16x1024xf32> to vector<16x512xf32>
    %257 = arith.mulf %256, %256 : vector<16x512xf32>
    %258 = arith.mulf %256, %257 : vector<16x512xf32>
    %cst_94 = arith.constant 4.471500e-02 : f32
    %259 = vector.broadcast %cst_94 : f32 to vector<16x512xf32>
    %260 = arith.mulf %259, %258 : vector<16x512xf32>
    %261 = arith.addf %256, %260 : vector<16x512xf32>
    %cst_95 = arith.constant 0.797884583 : f32
    %262 = vector.broadcast %cst_95 : f32 to vector<16x512xf32>
    %263 = arith.mulf %262, %261 : vector<16x512xf32>
    %264 = math.tanh %263 : vector<16x512xf32>
    %cst_96 = arith.constant 1.000000e+00 : f32
    %265 = vector.broadcast %cst_96 : f32 to vector<16x512xf32>
    %266 = arith.addf %265, %264 : vector<16x512xf32>
    %cst_97 = arith.constant 5.000000e-01 : f32
    %267 = vector.broadcast %cst_97 : f32 to vector<16x512xf32>
    %268 = arith.mulf %267, %266 : vector<16x512xf32>
    %269 = arith.mulf %256, %268 : vector<16x512xf32>
    %270 = vector.extract_strided_slice %255 {offsets = [0, 512], sizes = [16, 512], strides = [1, 1]} : vector<16x1024xf32> to vector<16x512xf32>
    %271 = arith.mulf %269, %270 : vector<16x512xf32>
    %272 = arith.truncf %271 : vector<16x512xf32> to vector<16x512xbf16>
    %c0_98 = arith.constant 0 : index
    %c0_99 = arith.constant 0 : index
    %273 = vector.load %arg14[%c0_98, %c0_99] : memref<512x128xbf16, #tpu.memory_space<vmem>>, vector<512x128xbf16>
    %cst_100 = arith.constant dense<0.000000e+00> : vector<16x128xf32>
    %274 = tpu.matmul %272, %273, %cst_100 {dimension_numbers = #tpu.dot_dimension_numbers<[1], [0], [0], [1], [0, 0, 1, 1], [], []>} : vector<16x512xbf16>, vector<512x128xbf16>, vector<16x128xf32> -> vector<16x128xf32>
    %275 = arith.addf %239, %274 : vector<16x128xf32>
    %c0_101 = arith.constant 0 : index
    %c0_102 = arith.constant 0 : index
    %276 = vector.load %arg15[%c0_101, %c0_102] : memref<16x128xf32, #tpu.memory_space<vmem>>, vector<16x128xf32>
    tpu.vector_store %arg15[%c0_101, %c0_102], %275 {strides = array<i32>} : memref<16x128xf32, #tpu.memory_space<vmem>>, vector<16x128xf32>,
    return
  }
}

</mosaic_0001>

<bundles_post_ra>
// kernel: tpu_custom_call.1
= control target key start
LH: loop header
LB: loop body
LE: loop exit
PB: predicated region body
PF: predicated region fallthrough
CT: control target
= control target key end

     0   :  { %s5088_s0 = inlined_call_operand.hbm [shape: f32[16,128], index: 0, kind: input, shape index: {}]   ;;  %s5089_s1 = inlined_call_operand.hbm [shape: bf16[16,128], index: 1, kind: input, shape index: {}]   ;;  %s5090_s2 = inlined_call_operand.hbm [shape: f32[2,8,8], index: 2, kind: input, shape index: {}]   ;;  %s5091_s3 = inlined_call_operand.hbm [shape: bf16[128,256], index: 3, kind: input, shape index: {}]   ;;  %s5092_s4 = inlined_call_operand.vmem [shape: f32[1,128], index: 4, kind: input, shape index: {}]   ;;  %s5093_s5 = inlined_call_operand.hbm [shape: bf16[128,256], index: 5, kind: input, shape index: {}]   ;;  %s5094_s6 = inlined_call_operand.vmem [shape: f32[1,128], index: 6, kind: input, shape index: {}]   ;;  %s5095_s7 = inlined_call_operand.vmem [shape: f32[1,128], index: 7, kind: input, shape index: {}]   ;;  %s5096_s8 = inlined_call_operand.hbm [shape: bf16[128,512], index: 8, kind: input, shape index: {}]   ;;  %s5097_s9 = inlined_call_operand.hbm [shape: bf16[128,1024], index: 9, kind: input, shape index: {}]   ;;  %s5098_s10 = inlined_call_operand.hbm [shape: bf16[512,128], index: 10, kind: input, shape index: {}]   ;;  %s5099_s11 = inlined_call_operand.vmem [shape: f32[1,128], index: 11, kind: input, shape index: {}]   ;;  %s5100_s12 = inlined_call_operand.vmem [shape: f32[1,128], index: 12, kind: input, shape index: {}]   ;;  %s5101_s13 = inlined_call_operand.hbm [shape: bf16[128,1024], index: 13, kind: input, shape index: {}]   ;;  %s5102_s14 = inlined_call_operand.hbm [shape: bf16[512,128], index: 14, kind: input, shape index: {}]   ;;  %s5103_s15 = inlined_call_operand.hbm [shape: f32[16,128], index: 15, kind: output, shape index: {0}]   ;;  %s5104_s16 = inlined_call_operand.hbm [shape: f32[16,128], index: 16, kind: output, shape index: {1}]  }
   0x1   :  { %5105 = sst [smem:[#allocation31_spill]] %s5088_s0 }
   0x2   :  { %22 = vsyncpa [#allocation4], 0 }
   0x3   :  { %23 = vsyncpa [#allocation7], 0 }
   0x4   :  { %24 = vsyncpa [#allocation10], 0 }
   0x5   :  { %25 = vsyncpa [#allocation13], 0 }
   0x6   :  { %26 = vsyncpa [#allocation16], 0 }
   0x7   :  { %27 = vsyncpa [#allocation19], 0 }
   0x8   :  { %28 = vsyncpa [#allocation5], 0 }
   0x9   :  { %29 = vsyncpa [#allocation22], 0  ;;  %s4639_s21 = smov [#allocation6]  }
   0xa   :  { %s47_s22 = sshll.u32 %s4639_s21, 4  ;;  %s48_s22 = int_to_ptr.vmem [resolvable:$true] %s47_s22 }
   0xb   :  { %s4391_s23 = scalar_lea.vmem %s48_s22, 128  ;;  %p4396_p1 = scmp.lt.s32.totalorder %s48_s22, %s48_s22 }
   0xc   :  { %p4392_p0 = scmp.ne.s32.totalorder %s48_s22, %s4391_s23  ;;  %p4397_p2 = scmp.lt.s32.totalorder %s4391_s23, %s4391_s23 }
   0xe   :  { %p4398_p3 = por %p4397_p2, %p4396_p1 }
  0x10   :  { %p4399_p4 = pnand %p4398_p3, %p4392_p0 }
  0x12   :  { %4402 = shalt.err (!%p4399_p4)
}
  0x13   :  { %s4640_s24 = smov 64   ;;  %s4641_s25 = smov 4  }
  0x14   :  { %53 = dma.hbm_to_vmem [thread:$0]  %s5089_s1, 128, %s48_s22, [#allocation7], %s4640_s24, %s4640_s24, %s4641_s25  }
  0x15   :  { %s4642_s28 = smov [#allocation9]   ;;  %s4643_s30 = smov [#allocation12]  }
  0x16   :  { %s71_s29 = sshll.u32 %s4642_s28, 4  ;;  %s101_s0 = sshll.u32 %s4643_s30, 4  ;;  %s72_s29 = int_to_ptr.vmem [resolvable:$true] %s71_s29  ;;  %s102_s0 = int_to_ptr.vmem [resolvable:$true] %s101_s0 }
  0x17   :  { %s4411_s17 = scalar_lea.vmem %s72_s29, 2048  ;;  %p4416_p6 = scmp.lt.s32.totalorder %s72_s29, %s72_s29 }
  0x18   :  { %p4412_p5 = scmp.ne.s32.totalorder %s72_s29, %s4411_s17  ;;  %p4417_p7 = scmp.lt.s32.totalorder %s4411_s17, %s4411_s17 }
  0x1a   :  { %p4418_p8 = por %p4417_p7, %p4416_p6 }
  0x1c   :  { %p4419_p9 = pnand %p4418_p8, %p4412_p5 }
  0x1e   :  { %4422 = shalt.err (!%p4419_p9)
}
  0x1f   :  { %s4644_s18 = smov 128   ;;  %s4645_s19 = smov 8  }
  0x20   :  { %77 = dma.hbm_to_vmem [thread:$0]  %s5091_s3, 2048, %s72_s29, [#allocation10], %s4644_s18, %s4644_s18, %s4645_s19  }
  0x21   :  { %s4431_s1 = scalar_lea.vmem %s102_s0, 4096  ;;  %p4436_p11 = scmp.lt.s32.totalorder %s102_s0, %s102_s0 }
  0x22   :  { %p4432_p10 = scmp.ne.s32.totalorder %s102_s0, %s4431_s1  ;;  %p4437_p12 = scmp.lt.s32.totalorder %s4431_s1, %s4431_s1 }
  0x24   :  { %p4438_p13 = por %p4437_p12, %p4436_p11 }
  0x26   :  { %p4439_p0 = pnand %p4438_p13, %p4432_p10 }
  0x28   :  { %4442 = shalt.err (!%p4439_p0)
}
  0x29   :  { %s4646_s22 = smov 256   ;;  %s4647_s23 = smov 16  }
  0x2a   :  { %107 = dma.hbm_to_vmem [thread:$0]  %s5096_s8, 4096, %s102_s0, [#allocation13], %s4646_s22, %s4646_s22, %s4647_s23  }
  0x2b   :  { %s4648_s28 = smov [#allocation15]   ;;  %s4649_s17 = smov [#allocation3]  }
  0x2c   :  { %s125_s30 = sshll.u32 %s4648_s28, 4  ;;  %s35_s20 = sshll.u32 %s4649_s17, 4  ;;  %s126_s30 = int_to_ptr.vmem [resolvable:$true] %s125_s30  ;;  %s36_s20 = int_to_ptr.vmem [resolvable:$true] %s35_s20 }
  0x2d   :  { %s4451_s3 = scalar_lea.vmem %s126_s30, 4096  ;;  %p4456_p2 = scmp.lt.s32.totalorder %s126_s30, %s126_s30 }
  0x2e   :  { %p4452_p1 = scmp.ne.s32.totalorder %s126_s30, %s4451_s3  ;;  %p4457_p3 = scmp.lt.s32.totalorder %s4451_s3, %s4451_s3 }
  0x30   :  { %p4458_p4 = por %p4457_p3, %p4456_p2 }
  0x32   :  { %p4459_p5 = pnand %p4458_p4, %p4452_p1 }
  0x34   :  { %4462 = shalt.err (!%p4459_p5)
}
  0x35   :  { %131 = dma.hbm_to_vmem [thread:$0]  %s5098_s10, 4096, %s126_s30, [#allocation16], %s4640_s24, %s4640_s24, %s4641_s25  }
  0x36   :  { %s4471_s8 = scalar_lea.vmem %s36_s20, 256  ;;  %p4476_p7 = scmp.lt.s32.totalorder %s36_s20, %s36_s20 }
  0x37   :  { %p4472_p6 = scmp.ne.s32.totalorder %s36_s20, %s4471_s8  ;;  %p4477_p8 = scmp.lt.s32.totalorder %s4471_s8, %s4471_s8 }
  0x39   :  { %p4478_p9 = por %p4477_p8, %p4476_p7 }
  0x3b   :  { %p4479_p10 = pnand %p4478_p9, %p4472_p6 }
  0x3d   :  { %4482 = shalt.err (!%p4479_p10)
}
  0x3e   :  { %s5106_s22 = sld [smem:[#allocation31_spill]]  ;;  %s4650_s23 = smov [#allocation8]  }
  0x3f   :  { %s59_s26 = sshll.u32 %s4650_s23, 4  ;;  %s4651_s27 = smov [#allocation11]   ;;  %s60_s26 = int_to_ptr.vmem [resolvable:$true] %s59_s26 }
  0x40   :  { %s85_s10 = sshll.u32 %s4651_s27, 4  ;;  %s4491_s28 = scalar_lea.vmem %s60_s26, 256  ;;  %s86_s10 = int_to_ptr.vmem [resolvable:$true] %s85_s10 }
  0x41   :  { %p4492_p11 = scmp.ne.s32.totalorder %s60_s26, %s4491_s28  ;;  %p4496_p12 = scmp.lt.s32.totalorder %s60_s26, %s60_s26 }
  0x42   :  { %p4497_p13 = scmp.lt.s32.totalorder %s4491_s28, %s4491_s28 }
  0x44   :  { %41 = dma.hbm_to_vmem [thread:$0]  %s5106_s22, 256, %s36_s20, [#allocation4], %s4644_s18, %s4644_s18, %s4645_s19  }
  0x45   :  { %p4498_p0 = por %p4497_p13, %p4496_p12 }
  0x47   :  { %p4499_p1 = pnand %p4498_p0, %p4492_p11 }
  0x49   :  { %4502 = shalt.err (!%p4499_p1)
}
  0x4a   :  { %65 = dma.hbm_to_vmem [thread:$0]  %s5090_s2, 256, %s60_s26, [#allocation7], %s4644_s18, %s4644_s18, %s4645_s19  }
  0x4b   :  { %s4511_s20 = scalar_lea.vmem %s86_s10, 2048  ;;  %p4516_p3 = scmp.lt.s32.totalorder %s86_s10, %s86_s10 }
  0x4c   :  { %p4512_p2 = scmp.ne.s32.totalorder %s86_s10, %s4511_s20  ;;  %p4517_p4 = scmp.lt.s32.totalorder %s4511_s20, %s4511_s20 }
  0x4e   :  { %p4518_p5 = por %p4517_p4, %p4516_p3 }
  0x50   :  { %p4519_p6 = pnand %p4518_p5, %p4512_p2 }
  0x52   :  { %4522 = shalt.err (!%p4519_p6)
}
  0x53   :  { %91 = dma.hbm_to_vmem [thread:$0]  %s5093_s5, 2048, %s86_s10, [#allocation10], %s4644_s18, %s4644_s18, %s4645_s19  }
  0x54   :  { %s4652_s21 = smov [#allocation14]  }
  0x55   :  { %s113_s8 = sshll.u32 %s4652_s21, 4  ;;  %s114_s8 = int_to_ptr.vmem [resolvable:$true] %s113_s8 }
  0x56   :  { %s4531_s0 = scalar_lea.vmem %s114_s8, 8192  ;;  %p4536_p8 = scmp.lt.s32.totalorder %s114_s8, %s114_s8 }
  0x57   :  { %p4532_p7 = scmp.ne.s32.totalorder %s114_s8, %s4531_s0  ;;  %p4537_p9 = scmp.lt.s32.totalorder %s4531_s0, %s4531_s0 }
  0x59   :  { %p4538_p10 = por %p4537_p9, %p4536_p8 }
  0x5b   :  { %p4539_p11 = pnand %p4538_p10, %p4532_p7 }
  0x5d   :  { %4542 = shalt.err (!%p4539_p11)
}
  0x5e   :  { %s4653_s2 = smov 512   ;;  %s4654_s1 = smov 32  }
  0x5f   :  { %119 = dma.hbm_to_vmem [thread:$0]  %s5097_s9, 8192, %s114_s8, [#allocation13], %s4653_s2, %s4653_s2, %s4654_s1  }
  0x60   :  { %s4655_s26 = smov [#allocation17]   ;;  %s4656_s28 = smov [#allocation18]  }
  0x61   :  { %s141_s27 = sshll.u32 %s4655_s26, 4  ;;  %s153_s5 = sshll.u32 %s4656_s28, 4  ;;  %s142_s27 = int_to_ptr.vmem [resolvable:$true] %s141_s27  ;;  %s154_s5 = int_to_ptr.vmem [resolvable:$true] %s153_s5 }
  0x62   :  { %s4551_s10 = scalar_lea.vmem %s142_s27, 8192  ;;  %p4556_p13 = scmp.lt.s32.totalorder %s142_s27, %s142_s27 }
  0x63   :  { %p4552_p12 = scmp.ne.s32.totalorder %s142_s27, %s4551_s10  ;;  %p4557_p0 = scmp.lt.s32.totalorder %s4551_s10, %s4551_s10 }
  0x65   :  { %p4558_p1 = por %p4557_p0, %p4556_p13 }
  0x67   :  { %p4559_p2 = pnand %p4558_p1, %p4552_p12 }
  0x69   :  { %4562 = shalt.err (!%p4559_p2)
}
  0x6a   :  { %147 = dma.hbm_to_vmem [thread:$0]  %s5101_s13, 8192, %s142_s27, [#allocation16], %s4653_s2, %s4653_s2, %s4654_s1  }
  0x6b   :  { %s4571_s20 = scalar_lea.vmem %s154_s5, 4096  ;;  %p4576_p4 = scmp.lt.s32.totalorder %s154_s5, %s154_s5 }
  0x6c   :  { %p4572_p3 = scmp.ne.s32.totalorder %s154_s5, %s4571_s20  ;;  %p4577_p5 = scmp.lt.s32.totalorder %s4571_s20, %s4571_s20 }
  0x6e   :  { %p4578_p6 = por %p4577_p5, %p4576_p4 }
  0x70   :  { %p4579_p7 = pnand %p4578_p6, %p4572_p3 }
  0x72   :  { %4582 = shalt.err (!%p4579_p7)
}
  0x73   :  { %159 = dma.hbm_to_vmem [thread:$0]  %s5102_s14, 4096, %s154_s5, [#allocation19], %s4640_s24, %s4640_s24, %s4641_s25  }
  0x74   :  { %4623 = dma.done.wait [#allocation4], 256  }
  0x75   :  { %4624 = vsyncadd [#allocation4], 4294967040 }
  0x76   :  { %4625 = dma.done.wait [#allocation7], 384  }
  0x77   :  { %4626 = vsyncadd [#allocation7], 4294966912 }
  0x78   :  { %4627 = dma.done.wait [#allocation10], 4096  }
  0x79   :  { %4628 = vsyncadd [#allocation10], 4294963200 }
  0x7a   :  { %4629 = dma.done.wait [#allocation13], 12288  }
  0x7b   :  { %4630 = vsyncadd [#allocation13], 4294955008 }
  0x7c   :  { %4631 = dma.done.wait [#allocation16], 12288  }
  0x7d   :  { %4632 = vsyncadd [#allocation16], 4294955008 }
  0x7e   :  { %4633 = dma.done.wait [#allocation19], 4096  }
  0x7f   :  { %4634 = vsyncadd [#allocation19], 4294963200  ;;  %v4657_v0 = vmov 0   ;;  %v4800_v1 = vld [vmem:[#allocation3] sm:$0xff]  ;;  %v4802_v2 = vld [vmem:[#allocation3 + $0x8] sm:$0xff]  ;;  %vm4659_vm0 = vmmov 0  }
  0x80   :  { %324 = vmatprep.mubr.bf16.mxu0 %v4657_v0  ;;  %494 = vmatprep.mubr.bf16.mxu1 %v4657_v0  ;;  %v529_v3 = vmul.f32 %v4800_v1, %v4800_v1  ;;  %v4144_v4 = vld [vmem:[#allocation9 + $0x74] ss:$8 sps:$4 sm:$0xff]   ;;  %v4146_v5 = vld [vmem:[#allocation9 + $0x70] ss:$8 sps:$4 sm:$0xff]   ;;  %v4147_v6 = vld [vmem:[#allocation9 + $0x64] ss:$8 sps:$4 sm:$0xff]   ;;  %v530_v7 = vmul.f32 %v4802_v2, %v4802_v2  ;;  %v195_v36 = vpack.c.bf16 %v4802_v2, %v4800_v1 }
  0x81   :  { %292 = vmatprep.subr.bf16.mxu0 %v4144_v4  ;;  %v4149_v8 = vld [vmem:[#allocation9 + $0x60] ss:$8 sps:$4 sm:$0xff]   ;;  %v4150_v9 = vld [vmem:[#allocation9 + $0x54] ss:$8 sps:$4 sm:$0xff]   ;;  %v4152_v11 = vld [vmem:[#allocation9 + $0x50] ss:$8 sps:$4 sm:$0xff]  }
  0x82   :  { %531 = vadd.xlane.f32.xlu0 %v529_v3  ;;  %293 = vmatpush1.bf16.msra.mxu0 %v4146_v5  ;;  %v4158_v10 = vld [vmem:[#allocation11 + $0x74] ss:$8 sps:$4 sm:$0xff]   ;;  %v4161_v12 = vld [vmem:[#allocation11 + $0x70] ss:$8 sps:$4 sm:$0xff]   ;;  %v4153_v13 = vld [vmem:[#allocation9 + $0x44] ss:$8 sps:$4 sm:$0xff]  }
  0x83   :  { %294 = vmatprep.subr.bf16.mxu0 %v4147_v6  ;;  %462 = vmatprep.subr.bf16.mxu1 %v4158_v10  ;;  %v4164_v14 = vld [vmem:[#allocation11 + $0x64] ss:$8 sps:$4 sm:$0xff]   ;;  %v4167_v15 = vld [vmem:[#allocation11 + $0x60] ss:$8 sps:$4 sm:$0xff]   ;;  %v4156_v17 = vld [vmem:[#allocation9 + $0x34] ss:$8 sps:$4 sm:$0xff]  }
  0x84   :  { %463 = vmatpush1.bf16.msra.mxu1 %v4161_v12  ;;  %v4155_v16 = vld [vmem:[#allocation9 + $0x40] ss:$8 sps:$4 sm:$0xff]   ;;  %v4170_v18 = vld [vmem:[#allocation11 + $0x54] ss:$8 sps:$4 sm:$0xff]   ;;  %v4173_v19 = vld [vmem:[#allocation11 + $0x50] ss:$8 sps:$4 sm:$0xff]  }
  0x85   :  { %464 = vmatprep.subr.bf16.mxu1 %v4164_v14  ;;  %v4176_v20 = vld [vmem:[#allocation11 + $0x44] ss:$8 sps:$4 sm:$0xff]   ;;  %v4160_v21 = vld [vmem:[#allocation9 + $0x30] ss:$8 sps:$4 sm:$0xff]   ;;  %v4179_v23 = vld [vmem:[#allocation11 + $0x40] ss:$8 sps:$4 sm:$0xff]  }
  0x86   :  { %533 = vadd.xlane.f32.xlu0 %v530_v7  ;;  %295 = vmatpush1.bf16.msra.mxu0 %v4149_v8  ;;  %v4162_v22 = vld [vmem:[#allocation9 + $0x24] ss:$8 sps:$4 sm:$0xff]   ;;  %v4180_v24 = vld [vmem:[#allocation11 + $0x34] ss:$8 sps:$4 sm:$0xff]   ;;  %v4166_v25 = vld [vmem:[#allocation9 + $0x20] ss:$8 sps:$4 sm:$0xff]  }
  0x87   :  { %296 = vmatprep.subr.bf16.mxu0 %v4150_v9  ;;  %v4168_v26 = vld [vmem:[#allocation9 + $0x14] ss:$8 sps:$4 sm:$0xff]   ;;  %v4182_v27 = vld [vmem:[#allocation11 + $0x30] ss:$8 sps:$4 sm:$0xff]   ;;  %v4183_v28 = vld [vmem:[#allocation11 + $0x24] ss:$8 sps:$4 sm:$0xff]  }
  0x88   :  { %465 = vmatpush1.bf16.msra.mxu1 %v4167_v15  ;;  %v4172_v29 = vld [vmem:[#allocation9 + $0x10] ss:$8 sps:$4 sm:$0xff]   ;;  %v4174_v30 = vld [vmem:[#allocation9 + $0x4] ss:$8 sps:$4 sm:$0xff]   ;;  %v4185_v31 = vld [vmem:[#allocation11 + $0x20] ss:$8 sps:$4 sm:$0xff]  }
  0x89   :  { %466 = vmatprep.subr.bf16.mxu1 %v4170_v18  ;;  %v4186_v32 = vld [vmem:[#allocation11 + $0x14] ss:$8 sps:$4 sm:$0xff]   ;;  %v4178_v33 = vld [vmem:[#allocation9] ss:$8 sps:$4 sm:$0xff]   ;;  %v4188_v35 = vld [vmem:[#allocation11 + $0x10] ss:$8 sps:$4 sm:$0xff]  }
  0x8a   :  { %297 = vmatpush1.bf16.msra.mxu0 %v4152_v11  ;;  %v4195_v34 = vld [vmem:[#allocation12 + $0xe4] ss:$16 sps:$4 sm:$0xff]   ;;  %v4193_v38 = vld [vmem:[#allocation12 + $0xe0] ss:$16 sps:$4 sm:$0xff]   ;;  %v4198_v41 = vld [vmem:[#allocation12 + $0xec] ss:$16 sps:$4 sm:$0xff]  }
  0x8b   :  { %298 = vmatprep.subr.bf16.mxu0 %v4153_v13  ;;  %v4189_v37 = vld [vmem:[#allocation11 + $0x4] ss:$8 sps:$4 sm:$0xff]   ;;  %v4191_v40 = vld [vmem:[#allocation11] ss:$8 sps:$4 sm:$0xff]   ;;  %vm1447_vm1 = vcmask 1043456   ;;  %vm1431_vm2 = vcmask 64512  }
  0x8c   :  { %467 = vmatpush1.bf16.msra.mxu1 %v4173_v19  ;;  %v4201_v39 = vld [vmem:[#allocation12 + $0xc4] ss:$16 sps:$4 sm:$0xff]   ;;  %v4199_v42 = vld [vmem:[#allocation12 + $0xc0] ss:$16 sps:$4 sm:$0xff]   ;;  %v4811_v43 = vld [vmem:[#allocation6] sm:$0xff]  }
  0x8d   :  { %468 = vmatprep.subr.bf16.mxu1 %v4176_v20  ;;  %v4207_v44 = vld [vmem:[#allocation12 + $0xa4] ss:$16 sps:$4 sm:$0xff]   ;;  %v4196_v45 = vld [vmem:[#allocation12 + $0xe8] ss:$16 sps:$4 sm:$0xff]   ;;  %v4204_v46 = vld [vmem:[#allocation12 + $0xcc] ss:$16 sps:$4 sm:$0xff]  }
  0x8e   :  { %299 = vmatpush1.bf16.msra.mxu0 %v4155_v16  ;;  %v4205_v47 = vld [vmem:[#allocation12 + $0xa0] ss:$16 sps:$4 sm:$0xff]   ;;  %v4213_v48 = vld [vmem:[#allocation12 + $0x84] ss:$16 sps:$4 sm:$0xff]   ;;  %v4202_v49 = vld [vmem:[#allocation12 + $0xc8] ss:$16 sps:$4 sm:$0xff]  }
  0x8f   :  { %300 = vmatprep.subr.bf16.mxu0 %v4156_v17  ;;  %v4210_v50 = vld [vmem:[#allocation12 + $0xac] ss:$16 sps:$4 sm:$0xff]   ;;  %v4211_v51 = vld [vmem:[#allocation12 + $0x80] ss:$16 sps:$4 sm:$0xff]   ;;  %v4208_v54 = vld [vmem:[#allocation12 + $0xa8] ss:$16 sps:$4 sm:$0xff]  }
  0x90   :  { %469 = vmatpush1.bf16.msra.mxu1 %v4179_v23  ;;  %v4815_v52 = vld [vmem:[#allocation14 + $0x1c0] sm:$0xff]  ;;  %v4216_v57 = vld [vmem:[#allocation12 + $0x8c] ss:$16 sps:$4 sm:$0xff]   ;;  %v4214_v62 = vld [vmem:[#allocation12 + $0x88] ss:$16 sps:$4 sm:$0xff]  }
  0x91   :  { %470 = vmatprep.subr.bf16.mxu1 %v4180_v24  ;;  %v4817_v53 = vld [vmem:[#allocation14 + $0x1e0] sm:$0xff]  ;;  %v4821_v60 = vld [vmem:[#allocation14 + $0x1c8] sm:$0xff] }
  0x92   :  { %301 = vmatpush1.bf16.msra.mxu0 %v4160_v21  ;;  %v4219_v55 = vld [vmem:[#allocation12 + $0x64] ss:$16 sps:$4 sm:$0xff]   ;;  %v3759_v56 = vcombine.low %v4815_v52, %v4817_v53  ;;  %v4217_v58 = vld [vmem:[#allocation12 + $0x60] ss:$16 sps:$4 sm:$0xff]   ;;  %v4823_v61 = vld [vmem:[#allocation14 + $0x1e8] sm:$0xff]  ;;  %v3760_v13 = vcombine.high %v4815_v52, %v4817_v53 }
  0x93   :  { %302 = vmatprep.subr.bf16.mxu0 %v4162_v22  ;;  %v4225_v59 = vld [vmem:[#allocation12 + $0x44] ss:$16 sps:$4 sm:$0xff]   ;;  %v4222_v63 = vld [vmem:[#allocation12 + $0x6c] ss:$16 sps:$4 sm:$0xff]   ;;  %v3761_v3 = vcombine.low %v4821_v60, %v4823_v61  ;;  %v4223_v4 = vld [vmem:[#allocation12 + $0x40] ss:$16 sps:$4 sm:$0xff]   ;;  %v3762_v17 = vcombine.high %v4821_v60, %v4823_v61 }
  0x94   :  { %471 = vmatpush1.bf16.msra.mxu1 %v4182_v27  ;;  %v4231_v5 = vld [vmem:[#allocation12 + $0x24] ss:$16 sps:$4 sm:$0xff]   ;;  %v4220_v6 = vld [vmem:[#allocation12 + $0x68] ss:$16 sps:$4 sm:$0xff]   ;;  %v4228_v7 = vld [vmem:[#allocation12 + $0x4c] ss:$16 sps:$4 sm:$0xff]  }
  0x95   :  { %472 = vmatprep.subr.bf16.mxu1 %v4183_v28  ;;  %v4229_v8 = vld [vmem:[#allocation12 + $0x20] ss:$16 sps:$4 sm:$0xff]   ;;  %v4237_v9 = vld [vmem:[#allocation12 + $0x4] ss:$16 sps:$4 sm:$0xff]   ;;  %v4226_v10 = vld [vmem:[#allocation12 + $0x48] ss:$16 sps:$4 sm:$0xff]  }
  0x96   :  { %303 = vmatpush1.bf16.msra.mxu0 %v4166_v25  ;;  %v4234_v11 = vld [vmem:[#allocation12 + $0x2c] ss:$16 sps:$4 sm:$0xff]   ;;  %v4235_v12 = vld [vmem:[#allocation12] ss:$16 sps:$4 sm:$0xff]   ;;  %v4232_v14 = vld [vmem:[#allocation12 + $0x28] ss:$16 sps:$4 sm:$0xff]  }
  0x97   :  { %304 = vmatprep.subr.bf16.mxu0 %v4168_v26  ;;  %v4240_v15 = vld [vmem:[#allocation12 + $0xc] ss:$16 sps:$4 sm:$0xff]   ;;  %v4238_v16 = vld [vmem:[#allocation12 + $0x8] ss:$16 sps:$4 sm:$0xff]   ;;  %v855_v52 = vld [vmem:[#allocation14 + $0xc0] sm:$0xff] }
  0x98   :  { %473 = vmatpush1.bf16.msra.mxu1 %v4185_v31  ;;  %v3670_v27 = vld [vmem:[%s5095_s7] ss:$0 sm:$0xff]  ;;  %v880_v31 = vld [vmem:[#allocation14 + $0x188] sm:$0xff]  ;;  %v847_v60 = vld [vmem:[#allocation14 + $0x80] sm:$0xff] }
  0x99   :  { %474 = vmatprep.subr.bf16.mxu1 %v4186_v32  ;;  %v884_v32 = vld [vmem:[#allocation14 + $0x1a8] sm:$0xff] }
  0x9a   :  { %305 = vmatpush1.bf16.msra.mxu0 %v4172_v29  ;;  %v879_v29 = vld [vmem:[#allocation14 + $0x180] sm:$0xff] }
  0x9b   :  { %306 = vmatprep.subr.bf16.mxu0 %v4174_v30  ;;  %v883_v30 = vld [vmem:[#allocation14 + $0x1a0] sm:$0xff] }
  0x9c   :  { %475 = vmatpush1.bf16.msra.mxu1 %v4188_v35 }
  0x9d   :  { %476 = vmatprep.subr.bf16.mxu1 %v4189_v37  ;;  %v871_v37 = vld [vmem:[#allocation14 + $0x140] sm:$0xff] }
  0x9e   :  { %307 = vmatpush1.bf16.msra.mxu0 %v4178_v33 }
  0x9f   :  { %745 = vmatprep.subr.bf16.mxu0 %v4195_v34 }
  0xa0   :  { %477 = vmatpush1.bf16.msra.mxu1 %v4191_v40  ;;  %v872_v40 = vld [vmem:[#allocation14 + $0x148] sm:$0xff] }
  0xa1   :  { %325 = vmatmul.mubr.bf16.vlgmr.msra.gmra.mxu0 %v195_v36  ;;  %788 = vmatprep.subr.bf16.mxu1 %v4198_v41  ;;  %v3752_v36 = vcombine.high %v879_v29, %v883_v30  ;;  %v3753_v41 = vcombine.low %v880_v31, %v884_v32 }
  0xa2   :  { %746 = vmatpush1.bf16.msra.mxu0 %v4193_v38  ;;  %777 = vmatprep.mubr.bf16.mxu0 %v4657_v0  ;;  %v3754_v38 = vcombine.high %v880_v31, %v884_v32 }
  0xa3   :  { %747 = vmatprep.subr.bf16.mxu0 %v4201_v39  ;;  %495 = vmatmul.mubr.bf16.vlgmr.msra.gmra.mxu1 %v4811_v43  ;;  %v875_v39 = vld [vmem:[#allocation14 + $0x160] sm:$0xff] }
  0xa4   :  { %789 = vmatpush1.bf16.msra.mxu1 %v4196_v45  ;;  %820 = vmatprep.mubr.bf16.mxu1 %v4657_v0 }
  0xa5   :  { %790 = vmatprep.subr.bf16.mxu1 %v4204_v46  ;;  %v867_v46 = vld [vmem:[#allocation14 + $0x120] sm:$0xff] }
  0xa6   :  { %748 = vmatpush1.bf16.msra.mxu0 %v4199_v42  ;;  %v3744_v42 = vcombine.high %v871_v37, %v875_v39 }
  0xa7   :  { %749 = vmatprep.subr.bf16.mxu0 %v4207_v44  ;;  %v863_v44 = vld [vmem:[#allocation14 + $0x100] sm:$0xff] }
  0xa8   :  { %791 = vmatpush1.bf16.msra.mxu1 %v4202_v49  ;;  %v3743_v49 = vcombine.low %v871_v37, %v875_v39 }
  0xa9   :  { %792 = vmatprep.subr.bf16.mxu1 %v4210_v50 }
  0xaa   :  { %750 = vmatpush1.bf16.msra.mxu0 %v4205_v47  ;;  %v864_v47 = vld [vmem:[#allocation14 + $0x108] sm:$0xff] }
  0xab   :  { %751 = vmatprep.subr.bf16.mxu0 %v4213_v48  ;;  %v868_v48 = vld [vmem:[#allocation14 + $0x128] sm:$0xff] }
  0xac   :  { %793 = vmatpush1.bf16.msra.mxu1 %v4208_v54  ;;  %v3738_v53 = vcombine.high %v864_v47, %v868_v48  ;;  %v859_v54 = vld [vmem:[#allocation14 + $0xe0] sm:$0xff] }
  0xad   :  { %794 = vmatprep.subr.bf16.mxu1 %v4216_v57  ;;  %v3735_v57 = vcombine.low %v863_v44, %v867_v46 }
  0xae   :  { %752 = vmatpush1.bf16.msra.mxu0 %v4211_v51  ;;  %v3736_v51 = vcombine.high %v863_v44, %v867_v46  ;;  %v873_v44 = vld [vmem:[#allocation14 + $0x150] sm:$0xff] }
  0xaf   :  { %753 = vmatprep.subr.bf16.mxu0 %v4219_v55  ;;  %v856_v55 = vld [vmem:[#allocation14 + $0xc8] sm:$0xff] }
  0xb0   :  { %795 = vmatpush1.bf16.msra.mxu1 %v4214_v62  ;;  %v851_v62 = vld [vmem:[#allocation14 + $0xa0] sm:$0xff] }
  0xb1   :  { %796 = vmatprep.subr.bf16.mxu1 %v4222_v63  ;;  %v848_v63 = vld [vmem:[#allocation14 + $0x88] sm:$0xff] }
  0xb2   :  { %754 = vmatpush1.bf16.msra.mxu0 %v4217_v58  ;;  %v3737_v58 = vcombine.low %v864_v47, %v868_v48 }
  0xb3   :  { %755 = vmatprep.subr.bf16.mxu0 %v4225_v59  ;;  %v3728_v59 = vcombine.high %v855_v52, %v859_v54 }
  0xb4   :  { %797 = vmatpush1.bf16.msra.mxu1 %v4220_v6  ;;  %v3720_v6 = vcombine.high %v847_v60, %v851_v62 }
  0xb5   :  { %798 = vmatprep.subr.bf16.mxu1 %v4228_v7  ;;  %v839_v7 = vld [vmem:[#allocation14 + $0x40] sm:$0xff] }
  0xb6   :  { %756 = vmatpush1.bf16.msra.mxu0 %v4223_v4  ;;  %v3727_v4 = vcombine.low %v855_v52, %v859_v54  ;;  %v861_v54 = vld [vmem:[#allocation14 + $0xf0] sm:$0xff] }
  0xb7   :  { %757 = vmatprep.subr.bf16.mxu0 %v4231_v5 }
  0xb8   :  { %799 = vmatpush1.bf16.msra.mxu1 %v4226_v10  ;;  %v840_v10 = vld [vmem:[#allocation14 + $0x48] sm:$0xff] }
  0xb9   :  { %800 = vmatprep.subr.bf16.mxu1 %v4234_v11  ;;  %v844_v11 = vld [vmem:[#allocation14 + $0x68] sm:$0xff] }
  0xba   :  { %758 = vmatpush1.bf16.msra.mxu0 %v4229_v8 }
  0xbb   :  { %759 = vmatprep.subr.bf16.mxu0 %v4237_v9  ;;  %v843_v9 = vld [vmem:[#allocation14 + $0x60] sm:$0xff] }
  0xbc   :  { %801 = vmatpush1.bf16.msra.mxu1 %v4232_v14  ;;  %v3712_v14 = vcombine.high %v839_v7, %v843_v9 }
  0xbd   :  { %802 = vmatprep.subr.bf16.mxu1 %v4240_v15  ;;  %v831_v15 = vld [vmem:[#allocation14] sm:$0xff] }
  0xbe   :  { %760 = vmatpush1.bf16.msra.mxu0 %v4235_v12  ;;  %v3719_v12 = vcombine.low %v847_v60, %v851_v62  ;;  %v841_v60 = vld [vmem:[#allocation14 + $0x50] sm:$0xff] }
  0xbf   :  { %1215 = vmatprep.subr.bf16.mxu0 %v3760_v13 }
  0xc0   :  { %803 = vmatpush1.bf16.msra.mxu1 %v4238_v16  ;;  %v3714_v16 = vcombine.high %v840_v10, %v844_v11 }
  0xc1   :  { %1258 = vmatprep.subr.bf16.mxu1 %v3762_v17  ;;  %v835_v17 = vld [vmem:[#allocation14 + $0x20] sm:$0xff] }
 0x10b   :  { %v532_v18 = vpop.xlane.xlu0 %531 }
 0x10c   :  { %v536_v19 = vmul.f32 0.0078125, %v532_v18  ;;  %v832_v18 = vld [vmem:[#allocation14 + $0x8] sm:$0xff] }
 0x10e   :  { %v538_v20 = vadd.f32 1e-05, %v536_v19  ;;  %v836_v19 = vld [vmem:[#allocation14 + $0x28] sm:$0xff] }
 0x10f   :  { %v534_v21 = vpop.xlane.xlu0 %533 }
 0x110   :  { %4305 = vrsqrt.f32 %v538_v20  ;;  %v537_v22 = vmul.f32 0.0078125, %v534_v21  ;;  %v3711_v20 = vcombine.low %v839_v7, %v843_v9  ;;  %v3713_v21 = vcombine.low %v840_v10, %v844_v11 }
 0x112   :  { %v539_v23 = vadd.f32 1e-05, %v537_v22  ;;  %v3704_v22 = vcombine.high %v831_v15, %v835_v17 }
 0x114   :  { %4307 = vrsqrt.f32 %v539_v23  ;;  %v3706_v23 = vcombine.high %v832_v18, %v836_v19 }
 0x11d   :  { %v4306_v24 = vpop.eup %4305 }
 0x11e   :  { %v542_v25 = vmul.f32 %v4306_v24, %v4800_v1  ;;  %v876_v1 = vld [vmem:[#allocation14 + $0x168] sm:$0xff]  ;;  %v889_v24 = vld [vmem:[#allocation14 + $0x1d0] sm:$0xff] }
 0x11f   :  { %v3746_v45 = vcombine.high %v872_v40, %v876_v1  ;;  %v3745_v50 = vcombine.low %v872_v40, %v876_v1 }
 0x120   :  { %v550_v33 = vmul.f32 %v3670_v27, %v542_v25  ;;  %v893_v25 = vld [vmem:[#allocation14 + $0x1f0] sm:$0xff] }
 0x121   :  { %v4308_v26 = vpop.eup %4307 }
 0x122   :  { %v543_v28 = vmul.f32 %v4308_v26, %v4802_v2  ;;  %v3751_v2 = vcombine.low %v879_v29, %v883_v30  ;;  %v3703_v26 = vcombine.low %v831_v15, %v835_v17  ;;  %v3763_v29 = vcombine.low %v889_v24, %v893_v25  ;;  %v3647_v30 = vld [vmem:[%s5092_s4] ss:$0 sm:$0xff] }
 0x124   :  { %v551_v34 = vmul.f32 %v3670_v27, %v543_v28  ;;  %v3705_v27 = vcombine.low %v832_v18, %v836_v19  ;;  %v3764_v28 = vcombine.high %v889_v24, %v893_v25  ;;  %v894_v24 = vld [vmem:[#allocation14 + $0x1f8] sm:$0xff] }
 0x125   :  { %v882_v25 = vld [vmem:[#allocation14 + $0x198] sm:$0xff] }
 0x126   :  { %v552_v35 = vpack.c.bf16 %v551_v34, %v550_v33 }
 0x128   :  { %778 = vmatmul.mubr.bf16.vlgmr.msra.gmra.mxu0 %v552_v35  ;;  %821 = vmatmul.mubr.bf16.vlgmr.msra.gmra.mxu1 %v552_v35  ;;  %v881_v35 = vld [vmem:[#allocation14 + $0x190] sm:$0xff] }
 0x129   :  { %1216 = vmatpush1.bf16.msra.mxu0 %v3759_v56  ;;  %1259 = vmatpush1.bf16.msra.mxu1 %v3761_v3  ;;  %v860_v56 = vld [vmem:[#allocation14 + $0xe8] sm:$0xff] }
 0x12a   :  { %1217 = vmatprep.subr.bf16.mxu0 %v3752_v36  ;;  %1260 = vmatprep.subr.bf16.mxu1 %v3754_v38  ;;  %v3730_v61 = vcombine.high %v856_v55, %v860_v56  ;;  %v852_v3 = vld [vmem:[#allocation14 + $0xa8] sm:$0xff]  ;;  %v3729_v5 = vcombine.low %v856_v55, %v860_v56  ;;  %v885_v36 = vld [vmem:[#allocation14 + $0x1b0] sm:$0xff]  ;;  %v4856_v38 = vld [vmem:[%s5094_s6] ss:$0 sm:$0xff] }
 0x12b   :  { %1247 = vmatprep.mubr.bf16.mxu0 %v4657_v0  ;;  %1290 = vmatprep.mubr.bf16.mxu1 %v4657_v0  ;;  %v3722_v8 = vcombine.high %v848_v63, %v852_v3  ;;  %v3721_v13 = vcombine.low %v848_v63, %v852_v3  ;;  %v3756_v39 = vcombine.high %v881_v35, %v885_v36  ;;  %v849_v55 = vld [vmem:[#allocation14 + $0x90] sm:$0xff] }
 0x12c   :  { %v3755_v1 = vcombine.low %v881_v35, %v885_v36  ;;  %v870_v35 = vld [vmem:[#allocation14 + $0x138] sm:$0xff] }
 0x12d   :  { %1218 = vmatpush1.bf16.msra.mxu0 %v3751_v2  ;;  %1261 = vmatpush1.bf16.msra.mxu1 %v3753_v41 }
 0x12e   :  { %1219 = vmatprep.subr.bf16.mxu0 %v3744_v42  ;;  %1262 = vmatprep.subr.bf16.mxu1 %v3746_v45  ;;  %v877_v45 = vld [vmem:[#allocation14 + $0x170] sm:$0xff] }
 0x12f   :  { %v3748_v46 = vcombine.high %v873_v44, %v877_v45  ;;  %v3747_v48 = vcombine.low %v873_v44, %v877_v45 }
 0x131   :  { %1220 = vmatpush1.bf16.msra.mxu0 %v3743_v49  ;;  %1263 = vmatpush1.bf16.msra.mxu1 %v3745_v50  ;;  %v865_v49 = vld [vmem:[#allocation14 + $0x110] sm:$0xff] }
 0x132   :  { %1221 = vmatprep.subr.bf16.mxu0 %v3736_v51  ;;  %1264 = vmatprep.subr.bf16.mxu1 %v3738_v53  ;;  %v869_v50 = vld [vmem:[#allocation14 + $0x130] sm:$0xff] }
 0x133   :  { %v3740_v51 = vcombine.high %v865_v49, %v869_v50  ;;  %v3739_v52 = vcombine.low %v865_v49, %v869_v50  ;;  %v857_v53 = vld [vmem:[#allocation14 + $0xd0] sm:$0xff]  ;;  %v834_v50 = vld [vmem:[#allocation14 + $0x18] sm:$0xff] }
 0x134   :  { %v3732_v56 = vcombine.high %v857_v53, %v861_v54 }
 0x135   :  { %1222 = vmatpush1.bf16.msra.mxu0 %v3735_v57  ;;  %1265 = vmatpush1.bf16.msra.mxu1 %v3737_v58  ;;  %v853_v57 = vld [vmem:[#allocation14 + $0xb0] sm:$0xff]  ;;  %v3731_v58 = vcombine.low %v857_v53, %v861_v54 }
 0x136   :  { %1223 = vmatprep.subr.bf16.mxu0 %v3728_v59  ;;  %1266 = vmatprep.subr.bf16.mxu1 %v3730_v61  ;;  %v3724_v59 = vcombine.high %v849_v55, %v853_v57  ;;  %v845_v61 = vld [vmem:[#allocation14 + $0x70] sm:$0xff]  ;;  %v3723_v3 = vcombine.low %v849_v55, %v853_v57 }
 0x137   :  { %v3715_v9 = vcombine.low %v841_v60, %v845_v61 }
 0x139   :  { %1224 = vmatpush1.bf16.msra.mxu0 %v3727_v4  ;;  %1267 = vmatpush1.bf16.msra.mxu1 %v3729_v5  ;;  %v3716_v4 = vcombine.high %v841_v60, %v845_v61  ;;  %v833_v5 = vld [vmem:[#allocation14 + $0x10] sm:$0xff] }
 0x13a   :  { %1225 = vmatprep.subr.bf16.mxu0 %v3720_v6  ;;  %1268 = vmatprep.subr.bf16.mxu1 %v3722_v8  ;;  %v837_v6 = vld [vmem:[#allocation14 + $0x30] sm:$0xff] }
 0x13b   :  { %v3708_v11 = vcombine.high %v833_v5, %v837_v6 }
 0x13d   :  { %1226 = vmatpush1.bf16.msra.mxu0 %v3719_v12  ;;  %1269 = vmatpush1.bf16.msra.mxu1 %v3721_v13  ;;  %v3707_v13 = vcombine.low %v833_v5, %v837_v6 }
 0x13e   :  { %1227 = vmatprep.subr.bf16.mxu0 %v3712_v14  ;;  %1270 = vmatprep.subr.bf16.mxu1 %v3714_v16 }
 0x141   :  { %1228 = vmatpush1.bf16.msra.mxu0 %v3711_v20  ;;  %1271 = vmatpush1.bf16.msra.mxu1 %v3713_v21  ;;  %v4658_v21 = vmov 0.0  }
 0x142   :  { %1229 = vmatprep.subr.bf16.mxu0 %v3704_v22  ;;  %1272 = vmatprep.subr.bf16.mxu1 %v3706_v23  ;;  %v890_v23 = vld [vmem:[#allocation14 + $0x1d8] sm:$0xff] }
 0x145   :  { %1230 = vmatpush1.bf16.msra.mxu0 %v3703_v26  ;;  %1273 = vmatpush1.bf16.msra.mxu1 %v3705_v27  ;;  %v3765_v26 = vcombine.low %v890_v23, %v894_v24  ;;  %v3766_v27 = vcombine.high %v890_v23, %v894_v24 }
 0x146   :  { %1301 = vmatprep.subr.bf16.mxu0 %v3764_v28  ;;  %v886_v28 = vld [vmem:[#allocation14 + $0x1b8] sm:$0xff] }
 0x147   :  { %1344 = vmatprep.subr.bf16.mxu1 %v3766_v27 }
 0x148   :  { %1248 = vmatmul.mubr.bf16.vlgmr.msra.gmra.mxu0 %v4811_v43  ;;  %1291 = vmatmul.mubr.bf16.vlgmr.msra.gmra.mxu1 %v4811_v43 }
 0x149   :  { %1302 = vmatpush1.bf16.msra.mxu0 %v3763_v29  ;;  %1333 = vmatprep.mubr.bf16.mxu0 %v4657_v0  ;;  %v3758_v29 = vcombine.high %v882_v25, %v886_v28 }
 0x14a   :  { %1376 = vmatprep.mubr.bf16.mxu1 %v4657_v0  ;;  %1303 = vmatprep.subr.bf16.mxu0 %v3756_v39  ;;  %v858_v39 = vld [vmem:[#allocation14 + $0xd8] sm:$0xff] }
 0x14b   :  { %1345 = vmatpush1.bf16.msra.mxu1 %v3765_v26 }
 0x14c   :  { %1346 = vmatprep.subr.bf16.mxu1 %v3758_v29 }
 0x14d   :  { %1304 = vmatpush1.bf16.msra.mxu0 %v3755_v1 }
 0x14e   :  { %1305 = vmatprep.subr.bf16.mxu0 %v3748_v46  ;;  %v842_v46 = vld [vmem:[#allocation14 + $0x58] sm:$0xff] }
 0x151   :  { %1306 = vmatpush1.bf16.msra.mxu0 %v3747_v48 }
 0x152   :  { %1307 = vmatprep.subr.bf16.mxu0 %v3740_v51  ;;  %v838_v51 = vld [vmem:[#allocation14 + $0x38] sm:$0xff] }
 0x153   :  { %v3710_v53 = vcombine.high %v834_v50, %v838_v51  ;;  %v3709_v54 = vcombine.low %v834_v50, %v838_v51 }
 0x155   :  { %1308 = vmatpush1.bf16.msra.mxu0 %v3739_v52 }
 0x156   :  { %1309 = vmatprep.subr.bf16.mxu0 %v3732_v56 }
 0x159   :  { %1310 = vmatpush1.bf16.msra.mxu0 %v3731_v58 }
 0x15a   :  { %1311 = vmatprep.subr.bf16.mxu0 %v3724_v59 }
 0x15d   :  { %1312 = vmatpush1.bf16.msra.mxu0 %v3723_v3 }
 0x15e   :  { %1313 = vmatprep.subr.bf16.mxu0 %v3716_v4 }
 0x161   :  { %v326_v31 = vpop.f32.mrf.mxu0  ;;  %1314 = vmatpush1.bf16.msra.mxu0 %v3715_v9 }
 0x162   :  { %v342_v32 = vadd.f32 %v3647_v30, %v326_v31  ;;  %1315 = vmatprep.subr.bf16.mxu0 %v3708_v11  ;;  %v878_v31 = vld [vmem:[#allocation14 + $0x178] sm:$0xff] }
 0x163   :  { %v4851_v33 = vpop.f32.mrf.mxu0  ;;  %v496_v2 = vpop.f32.mrf.mxu1 }
 0x164   :  { %v3648_v34 = vmul.f32 -1.442695, %v342_v32  ;;  %v512_v42 = vadd.f32 %v4856_v38, %v496_v2  ;;  %v3757_v32 = vcombine.low %v882_v25, %v886_v28 }
 0x165   :  { %v330_v37 = vpop.f32.mrf.mxu0  ;;  %1316 = vmatpush1.bf16.msra.mxu0 %v3707_v13  ;;  %v498_v20 = vpop.f32.mrf.mxu1 }
 0x166   :  { %4309 = vpow2.f32 %v3648_v34  ;;  %v343_v40 = vadd.f32 %v3647_v30, %v330_v37  ;;  %v3668_v47 = vmul.f32 -1.442695, %v512_v42  ;;  %4025 = vmatprep.subr.bf16.mxu0 %v4658_v21  ;;  %v874_v30 = vld [vmem:[#allocation14 + $0x158] sm:$0xff]  ;;  %1347 = vmatpush1.bf16.msra.mxu1 %v3757_v32 }
 0x167   :  { %v332_v16 = vpop.f32.mrf.mxu0  ;;  %v866_v34 = vld [vmem:[#allocation14 + $0x118] sm:$0xff]  ;;  %v3749_v36 = vcombine.low %v874_v30, %v878_v31  ;;  %v4870_v58 = vpop.f32.mrf.mxu1 }
 0x168   :  { %v3649_v41 = vmul.f32 -1.442695, %v343_v40  ;;  %1334 = vmatmul.mubr.bf16.vlgmr.msra.gmra.mxu0 %v4811_v43  ;;  %v3742_v37 = vcombine.high %v866_v34, %v870_v35  ;;  %v862_v40 = vld [vmem:[#allocation14 + $0xf8] sm:$0xff]  ;;  %v3741_v1 = vcombine.low %v866_v34, %v870_v35  ;;  %v1387_v35 = vld [vmem:[#allocation8] sm:$0xff] }
 0x169   :  { %4027 = vmatprep.mubr.msk.bf16.mxu0 %vm4659_vm0, %v4658_v21  ;;  %v3734_v2 = vcombine.high %v858_v39, %v862_v40  ;;  %v854_v42 = vld [vmem:[#allocation14 + $0xb8] sm:$0xff]  ;;  %v3733_v44 = vcombine.low %v858_v39, %v862_v40  ;;  %v4872_v59 = vpop.f32.mrf.mxu1 }
 0x16a   :  { %4311 = vpow2.f32 %v3649_v41  ;;  %v850_v41 = vld [vmem:[#allocation14 + $0x98] sm:$0xff] }
 0x16b   :  { %4313 = vpow2.f32 %v3668_v47  ;;  %v3726_v45 = vcombine.high %v850_v41, %v854_v42  ;;  %v846_v47 = vld [vmem:[#allocation14 + $0x78] sm:$0xff]  ;;  %v3725_v48 = vcombine.low %v850_v41, %v854_v42 }
 0x16c   :  { %v3718_v49 = vcombine.high %v842_v46, %v846_v47  ;;  %v3717_v52 = vcombine.low %v842_v46, %v846_v47 }
 0x173   :  { %v4310_v62 = vpop.eup %4309 }
 0x174   :  { %v350_v63 = vadd.f32 1.0, %v4310_v62 }
 0x176   :  { %4315 = vrcp.f32 %v350_v63 }
 0x177   :  { %v4312_v7 = vpop.eup %4311 }
 0x178   :  { %v351_v8 = vadd.f32 1.0, %v4312_v7  ;;  %v4314_v10 = vpop.eup %4313 }
 0x179   :  { %v520_v12 = vadd.f32 1.0, %v4314_v10 }
 0x17a   :  { %4317 = vrcp.f32 %v351_v8 }
 0x17b   :  { %4319 = vrcp.f32 %v520_v12 }
 0x183   :  { %v4316_v14 = vpop.eup %4315 }
 0x184   :  { %v356_v15 = vmul.f32 %v4316_v14, %v4851_v33  ;;  %v3750_v33 = vcombine.high %v874_v30, %v878_v31 }
 0x186   :  { %358 = vst [vmem:[#allocation21] sm:$0xff] %v356_v15  ;;  %1348 = vmatprep.subr.bf16.mxu1 %v3750_v33 }
 0x187   :  { %v4318_v17 = vpop.eup %4317  ;;  %1349 = vmatpush1.bf16.msra.mxu1 %v3749_v36 }
 0x188   :  { %v357_v18 = vmul.f32 %v4318_v17, %v332_v16  ;;  %v4320_v19 = vpop.eup %4319  ;;  %1350 = vmatprep.subr.bf16.mxu1 %v3742_v37 }
 0x189   :  { %v4862_v22 = vmul.f32 %v4320_v19, %v498_v20 }
 0x18a   :  { %359 = vst [vmem:[#allocation21 + $0x8] sm:$0xff] %v357_v18 }
 0x18b   :  { %1351 = vmatpush1.bf16.msra.mxu1 %v3741_v1 }
 0x18c   :  { %1352 = vmatprep.subr.bf16.mxu1 %v3734_v2 }
 0x18f   :  { %1353 = vmatpush1.bf16.msra.mxu1 %v3733_v44 }
 0x190   :  { %1354 = vmatprep.subr.bf16.mxu1 %v3726_v45 }
 0x193   :  { %1355 = vmatpush1.bf16.msra.mxu1 %v3725_v48 }
 0x194   :  { %1356 = vmatprep.subr.bf16.mxu1 %v3718_v49 }
 0x197   :  { %1357 = vmatpush1.bf16.msra.mxu1 %v3717_v52 }
 0x198   :  { %1358 = vmatprep.subr.bf16.mxu1 %v3710_v53 }
 0x19b   :  { %1359 = vmatpush1.bf16.msra.mxu1 %v3709_v54 }
 0x19c   :  { %4031 = vmatprep.subr.bf16.mxu1 %v4658_v21 }
 0x19e   :  { %1377 = vmatmul.mubr.bf16.vlgmr.msra.gmra.mxu1 %v4811_v43 }
 0x19f   :  { %4033 = vmatprep.mubr.msk.bf16.mxu1 %vm4659_vm0, %v4658_v21 }
 0x1e8   :  { %v779_v55 = vpop.f32.mrf.mxu0  ;;  %v822_v61 = vpop.f32.mrf.mxu1 }
 0x1e9   :  { %v1388_v43 = vpack.c.bf16 %v779_v55, %v779_v55  ;;  %v1594_v11 = vpack.c.bf16 %v822_v61, %v822_v61 }
 0x1ea   :  { %v781_v56 = vpop.f32.mrf.mxu0  ;;  %v824_v3 = vpop.f32.mrf.mxu1 }
 0x1eb   :  { %v1492_v10 = vpack.c.bf16 %v781_v56, %v781_v56  ;;  %v1696_v15 = vpack.c.bf16 %v824_v3, %v824_v3 }
 0x1ec   :  { %v783_v57 = vpop.f32.mrf.mxu0  ;;  %v826_v5 = vpop.f32.mrf.mxu1 }
 0x1ed   :  { %v1800_v18 = vpack.c.bf16 %v783_v57, %v783_v57  ;;  %v2004_v26 = vpack.c.bf16 %v826_v5, %v826_v5 }
 0x1ee   :  { %v785_v60 = vpop.f32.mrf.mxu0  ;;  %v828_v7 = vpop.f32.mrf.mxu1 }
 0x1ef   :  { %v1902_v20 = vpack.c.bf16 %v785_v60, %v785_v60  ;;  %v2106_v31 = vpack.c.bf16 %v828_v7, %v828_v7 }
 0x208   :  { %v1249_v62 = vpop.f32.mrf.mxu0  ;;  %v1292_v8 = vpop.f32.mrf.mxu1 }
 0x209   :  { %v1389_v63 = vpack.c.bf16 %v1249_v62, %v1249_v62  ;;  %v1595_v9 = vpack.c.bf16 %v1292_v8, %v1292_v8  ;;  %v1799_v62 = vld [vmem:[#allocation8 + $0x8] sm:$0xff] }
 0x20a   :  { %v1251_v4 = vpop.f32.mrf.mxu0  ;;  %v1294_v12 = vpop.f32.mrf.mxu1 }
 0x20b   :  { %4026 = vmatpush3.bf16.xpose.msra.mxu0 %v1389_v63  ;;  %v1493_v6 = vpack.c.bf16 %v1251_v4, %v1251_v4  ;;  %v1697_v13 = vpack.c.bf16 %v1294_v12, %v1294_v12 }
 0x20c   :  { %4037 = vmatprep.subr.bf16.mxu0 %v4658_v21  ;;  %v1253_v14 = vpop.f32.mrf.mxu0  ;;  %v1296_v23 = vpop.f32.mrf.mxu1 }
 0x20d   :  { %v1801_v16 = vpack.c.bf16 %v1253_v14, %v1253_v14  ;;  %v2005_v24 = vpack.c.bf16 %v1296_v23, %v1296_v23 }
 0x20e   :  { %v1255_v17 = vpop.f32.mrf.mxu0  ;;  %v1298_v25 = vpop.f32.mrf.mxu1 }
 0x20f   :  { %v1903_v19 = vpack.c.bf16 %v1255_v17, %v1255_v17  ;;  %v2107_v27 = vpack.c.bf16 %v1298_v25, %v1298_v25 }
 0x212   :  { %4028 = vmatmul.mubr.bf16.vlgmr.msra.gmra.mxu0 %v1388_v43 }
 0x213   :  { %4038 = vmatpush3.bf16.xpose.msra.mxu0 %v1493_v6  ;;  %4039 = vmatprep.mubr.msk.bf16.mxu0 %vm4659_vm0, %v4658_v21 }
 0x214   :  { %4049 = vmatprep.subr.bf16.mxu0 %v4658_v21 }
 0x21a   :  { %4040 = vmatmul.mubr.bf16.vlgmr.msra.gmra.mxu0 %v1492_v10 }
 0x21b   :  { %4050 = vmatpush3.bf16.xpose.msra.mxu0 %v1595_v9  ;;  %4051 = vmatprep.mubr.msk.bf16.mxu0 %vm4659_vm0, %v4658_v21 }
 0x21c   :  { %4061 = vmatprep.subr.bf16.mxu0 %v4658_v21 }
 0x222   :  { %4052 = vmatmul.mubr.bf16.vlgmr.msra.gmra.mxu0 %v1594_v11 }
 0x223   :  { %4062 = vmatpush3.bf16.xpose.msra.mxu0 %v1697_v13  ;;  %4063 = vmatprep.mubr.msk.bf16.mxu0 %vm4659_vm0, %v4658_v21 }
 0x224   :  { %4073 = vmatprep.subr.bf16.mxu0 %v4658_v21 }
 0x228   :  { %v1335_v28 = vpop.f32.mrf.mxu0 }
 0x229   :  { %v1390_v29 = vpack.c.bf16 %v1335_v28, %v1335_v28 }
 0x22a   :  { %4064 = vmatmul.mubr.bf16.vlgmr.msra.gmra.mxu0 %v1696_v15  ;;  %v4897_v32 = vpop.f32.mrf.mxu0 }
 0x22b   :  { %4074 = vmatpush3.bf16.xpose.msra.mxu0 %v1801_v16  ;;  %4075 = vmatprep.mubr.msk.bf16.mxu0 %vm4659_vm0, %v4658_v21  ;;  %v1449_v30 = vsel %vm1447_vm1, %v1390_v29, 0 }
 0x22c   :  { %4085 = vmatprep.subr.bf16.mxu0 %v4658_v21  ;;  %4032 = vmatpush3.bf16.msra.mxu1 %v1449_v30  ;;  %v4899_v33 = vpop.f32.mrf.mxu0 }
 0x22d   :  { %4043 = vmatprep.subr.bf16.mxu1 %v4658_v21 }
 0x22e   :  { %v4901_v34 = vpop.f32.mrf.mxu0 }
 0x232   :  { %4076 = vmatmul.mubr.bf16.vlgmr.msra.gmra.mxu0 %v1800_v18 }
 0x233   :  { %4086 = vmatpush3.bf16.xpose.msra.mxu0 %v1903_v19  ;;  %4087 = vmatprep.mubr.msk.bf16.mxu0 %vm4659_vm0, %v4658_v21 }
 0x234   :  { %4097 = vmatprep.subr.bf16.mxu0 %v4658_v21 }
 0x23a   :  { %4088 = vmatmul.mubr.bf16.vlgmr.msra.gmra.mxu0 %v1902_v20 }
 0x23b   :  { %4098 = vmatpush3.bf16.xpose.msra.mxu0 %v2005_v24  ;;  %4099 = vmatprep.mubr.msk.bf16.mxu0 %vm4659_vm0, %v4658_v21 }
 0x23c   :  { %4109 = vmatprep.subr.bf16.mxu0 %v4658_v21 }
 0x242   :  { %4100 = vmatmul.mubr.bf16.vlgmr.msra.gmra.mxu0 %v2004_v26 }
 0x243   :  { %4110 = vmatpush3.bf16.xpose.msra.mxu0 %v2107_v27  ;;  %4111 = vmatprep.mubr.msk.bf16.mxu0 %vm4659_vm0, %v4658_v21 }
 0x24a   :  { %4112 = vmatmul.mubr.bf16.vlgmr.msra.gmra.mxu0 %v2106_v31 }
 0x2d2   :  { %v1425_v36 = vpop.f32.mrf.mxu0 }
 0x2d3   :  { %v1426_v37 = vadd.f32 %v1425_v36, %v1387_v35 }
 0x2d4   :  { %v4029_v39 = vpop.f32.mrf.mxu0 }
 0x2d5   :  { %v1432_v40 = vsel %vm1431_vm2, %v1426_v37, -inf }
 0x2d6   :  { %1433 = vmax.xlane.f32.xlu1 %v1432_v40  ;;  %v1428_v1 = vpop.f32.mrf.mxu0 }
 0x2d8   :  { %v4030_v2 = vpop.f32.mrf.mxu0 }
 0x2da   :  { %v1529_v41 = vpop.f32.mrf.mxu0 }
 0x2db   :  { %v1530_v42 = vadd.f32 %v1529_v41, %v1387_v35 }
 0x2dc   :  { %v4041_v44 = vpop.f32.mrf.mxu0 }
 0x2dd   :  { %v1535_v45 = vsel %vm1431_vm2, %v1530_v42, -inf }
 0x2de   :  { %1536 = vmax.xlane.f32.xlu1 %v1535_v45  ;;  %v1532_v46 = vpop.f32.mrf.mxu0 }
 0x2e0   :  { %v4042_v47 = vpop.f32.mrf.mxu0 }
 0x2e2   :  { %v1631_v48 = vpop.f32.mrf.mxu0 }
 0x2e3   :  { %v1632_v49 = vadd.f32 %v1631_v48, %v1387_v35 }
 0x2e4   :  { %v4053_v50 = vpop.f32.mrf.mxu0 }
 0x2e5   :  { %v1637_v51 = vsel %vm1431_vm2, %v1632_v49, -inf }
 0x2e6   :  { %1638 = vmax.xlane.f32.xlu0 %v1637_v51  ;;  %v1634_v52 = vpop.f32.mrf.mxu0 }
 0x2e8   :  { %v4054_v53 = vpop.f32.mrf.mxu0 }
 0x2ea   :  { %v1733_v54 = vpop.f32.mrf.mxu0 }
 0x2eb   :  { %v1734_v55 = vadd.f32 %v1733_v54, %v1387_v35 }
 0x2ec   :  { %v4065_v56 = vpop.f32.mrf.mxu0 }
 0x2ed   :  { %v1739_v57 = vsel %vm1431_vm2, %v1734_v55, -inf }
 0x2ee   :  { %1740 = vmax.xlane.f32.xlu1 %v1739_v57  ;;  %v1736_v60 = vpop.f32.mrf.mxu0 }
 0x2f0   :  { %v4066_v61 = vpop.f32.mrf.mxu0 }
 0x2f2   :  { %v1837_v63 = vpop.f32.mrf.mxu0 }
 0x2f3   :  { %v1838_v3 = vadd.f32 %v1837_v63, %v1799_v62 }
 0x2f4   :  { %v4077_v4 = vpop.f32.mrf.mxu0 }
 0x2f5   :  { %v1843_v43 = vsel %vm1431_vm2, %v1838_v3, -inf }
 0x2f6   :  { %1844 = vmax.xlane.f32.xlu0 %v1843_v43  ;;  %v1840_v5 = vpop.f32.mrf.mxu0 }
 0x2f8   :  { %v4078_v6 = vpop.f32.mrf.mxu0 }
 0x2fa   :  { %v1939_v7 = vpop.f32.mrf.mxu0 }
 0x2fb   :  { %v1940_v8 = vadd.f32 %v1939_v7, %v1799_v62 }
 0x2fc   :  { %v4089_v9 = vpop.f32.mrf.mxu0 }
 0x2fd   :  { %v1945_v10 = vsel %vm1431_vm2, %v1940_v8, -inf }
 0x2fe   :  { %1946 = vmax.xlane.f32.xlu1 %v1945_v10  ;;  %v1942_v11 = vpop.f32.mrf.mxu0 }
 0x300   :  { %v4090_v12 = vpop.f32.mrf.mxu0 }
 0x302   :  { %v2041_v13 = vpop.f32.mrf.mxu0 }
 0x303   :  { %v2042_v14 = vadd.f32 %v2041_v13, %v1799_v62  ;;  %v1494_v13 = vpack.c.bf16 %v4897_v32, %v4897_v32 }
 0x304   :  { %v4101_v15 = vpop.f32.mrf.mxu0 }
 0x305   :  { %v2047_v16 = vsel %vm1431_vm2, %v2042_v14, -inf }
 0x306   :  { %2048 = vmax.xlane.f32.xlu0 %v2047_v16  ;;  %v2044_v17 = vpop.f32.mrf.mxu0 }
 0x307   :  { %v1551_v17 = vsel %vm1447_vm1, %v1494_v13, 0  ;;  %v4253_v13 = vld [vmem:[#allocation15 + $0x50] sm:$0xff]  }
 0x308   :  { %v4102_v18 = vpop.f32.mrf.mxu0 }
 0x309   :  { %v1378_v18 = vpop.f32.mrf.mxu1 }
 0x30a   :  { %v2143_v19 = vpop.f32.mrf.mxu0 }
 0x30b   :  { %v2144_v20 = vadd.f32 %v2143_v19, %v1799_v62  ;;  %v1596_v19 = vpack.c.bf16 %v1378_v18, %v1378_v18  ;;  %v4258_v18 = vld [vmem:[#allocation15 + $0xe8] sm:$0xff]  }
 0x30c   :  { %v4113_v23 = vpop.f32.mrf.mxu0 }
 0x30d   :  { %v2149_v24 = vsel %vm1431_vm2, %v2144_v20, -inf  ;;  %v1653_v32 = vsel %vm1447_vm1, %v1596_v19, 0  ;;  %v4259_v19 = vld [vmem:[#allocation15 + $0x8] sm:$0xff]  }
 0x30e   :  { %2150 = vmax.xlane.f32.xlu1 %v2149_v24  ;;  %v2146_v25 = vpop.f32.mrf.mxu0 }
 0x310   :  { %v4114_v26 = vpop.f32.mrf.mxu0 }
 0x35f   :  { %v1434_v27 = vpop.xlane.xlu1 %1433 }
 0x360   :  { %v1435_v28 = vsub.f32 %v1426_v37, %v1434_v27  ;;  %v1380_v27 = vpop.f32.mrf.mxu1 }
 0x362   :  { %v1436_v29 = vmul.f32 1.442695, %v1435_v28  ;;  %v1698_v28 = vpack.c.bf16 %v1380_v27, %v1380_v27  ;;  %v4266_v27 = vld [vmem:[#allocation15 + $0x98] sm:$0xff]  }
 0x364   :  { %4321 = vpow2.f32 %v1436_v29 }
 0x367   :  { %v1537_v30 = vpop.xlane.xlu1 %1536 }
 0x368   :  { %v1538_v31 = vsub.f32 %v1530_v42, %v1537_v30 }
 0x36a   :  { %v1539_v35 = vmul.f32 1.442695, %v1538_v31 }
 0x36c   :  { %4323 = vpow2.f32 %v1539_v35  ;;  %v1755_v35 = vsel %vm1447_vm1, %v1698_v28, 0  ;;  %v4267_v28 = vld [vmem:[#allocation15 + $0xd0] sm:$0xff]  }
 0x36f   :  { %v1639_v36 = vpop.xlane.xlu0 %1638 }
 0x370   :  { %v1640_v39 = vsub.f32 %v1632_v49, %v1639_v36 }
 0x371   :  { %v4322_v40 = vpop.eup %4321 }
 0x372   :  { %v1641_v1 = vmul.f32 1.442695, %v1640_v39  ;;  %v1438_v2 = vsel %vm1431_vm2, %v4322_v40, 0.0  ;;  %v1802_v39 = vpack.c.bf16 %v4899_v33, %v4899_v33 }
 0x373   :  { %1439 = vadd.xlane.f32.xlu0 %v1438_v2 }
 0x374   :  { %4325 = vpow2.f32 %v1641_v1 }
 0x377   :  { %v1741_v41 = vpop.xlane.xlu1 %1740 }
 0x378   :  { %v1742_v44 = vsub.f32 %v1734_v55, %v1741_v41  ;;  %v1859_v41 = vsel %vm1447_vm1, %v1802_v39, 0 }
 0x379   :  { %v4324_v45 = vpop.eup %4323 }
 0x37a   :  { %v1743_v46 = vmul.f32 1.442695, %v1742_v44  ;;  %v1541_v37 = vsel %vm1431_vm2, %v4324_v45, 0.0 }
 0x37b   :  { %1542 = vadd.xlane.f32.xlu1 %v1541_v37 }
 0x37c   :  { %4327 = vpow2.f32 %v1743_v46 }
 0x37f   :  { %v1845_v47 = vpop.xlane.xlu0 %1844 }
 0x380   :  { %v1846_v42 = vsub.f32 %v1838_v3, %v1845_v47 }
 0x381   :  { %v4326_v48 = vpop.eup %4325 }
 0x382   :  { %v1847_v50 = vmul.f32 1.442695, %v1846_v42  ;;  %v1643_v49 = vsel %vm1431_vm2, %v4326_v48, 0.0 }
 0x383   :  { %1644 = vadd.xlane.f32.xlu0 %v1643_v49 }
 0x384   :  { %4329 = vpow2.f32 %v1847_v50 }
 0x387   :  { %v1947_v51 = vpop.xlane.xlu1 %1946 }
 0x388   :  { %v1948_v52 = vsub.f32 %v1940_v8, %v1947_v51 }
 0x389   :  { %v4914_v53 = vpop.eup %4327 }
 0x38a   :  { %v1949_v54 = vmul.f32 1.442695, %v1948_v52  ;;  %v1745_v55 = vsel %vm1431_vm2, %v4914_v53, 0.0 }
 0x38b   :  { %1746 = vadd.xlane.f32.xlu1 %v1745_v55 }
 0x38c   :  { %4331 = vpow2.f32 %v1949_v54 }
 0x38f   :  { %v2049_v56 = vpop.xlane.xlu0 %2048 }
 0x390   :  { %v2050_v57 = vsub.f32 %v2042_v14, %v2049_v56 }
 0x391   :  { %v4918_v60 = vpop.eup %4329 }
 0x392   :  { %v2051_v61 = vmul.f32 1.442695, %v2050_v57  ;;  %v1849_v62 = vsel %vm1431_vm2, %v4918_v60, 0.0 }
 0x393   :  { %1850 = vadd.xlane.f32.xlu0 %v1849_v62 }
 0x394   :  { %4333 = vpow2.f32 %v2051_v61 }
 0x397   :  { %v2151_v63 = vpop.xlane.xlu1 %2150 }
 0x398   :  { %v2152_v3 = vsub.f32 %v2144_v20, %v2151_v63 }
 0x399   :  { %v4922_v4 = vpop.eup %4331 }
 0x39a   :  { %v2153_v43 = vmul.f32 1.442695, %v2152_v3  ;;  %v1951_v5 = vsel %vm1431_vm2, %v4922_v4, 0.0  ;;  %v4241_v3 = vld [vmem:[#allocation15 + $0x78] sm:$0xff]  }
 0x39b   :  { %1952 = vadd.xlane.f32.xlu1 %v1951_v5  ;;  %3937 = vmatprep.subr.bf16.mxu0 %v4241_v3  ;;  %v4244_v5 = vld [vmem:[#allocation15 + $0x30] sm:$0xff]  }
 0x39c   :  { %4335 = vpow2.f32 %v2153_v43  ;;  %v4243_v43 = vld [vmem:[#allocation15 + $0x70] sm:$0xff]  }
 0x3a1   :  { %v4926_v6 = vpop.eup %4333 }
 0x3a2   :  { %v2053_v7 = vsel %vm1431_vm2, %v4926_v6, 0.0 }
 0x3a3   :  { %2054 = vadd.xlane.f32.xlu0 %v2053_v7  ;;  %v4246_v7 = vld [vmem:[#allocation15 + $0x28] sm:$0xff]  }
 0x3a9   :  { %v4930_v8 = vpop.eup %4335 }
 0x3aa   :  { %v2155_v9 = vsel %vm1431_vm2, %v4930_v8, 0.0 }
 0x3ab   :  { %2156 = vadd.xlane.f32.xlu1 %v2155_v9  ;;  %v4247_v9 = vld [vmem:[#allocation15 + $0x60] sm:$0xff]  }
 0x3fc   :  { %v1440_v10 = vpop.xlane.xlu0 %1439 }
 0x3fd   :  { %4337 = vrcp.f32 %v1440_v10  ;;  %v4250_v10 = vld [vmem:[#allocation15 + $0xf8] sm:$0xff]  }
 0x404   :  { %v1543_v11 = vpop.xlane.xlu1 %1542 }
 0x405   :  { %4339 = vrcp.f32 %v1543_v11  ;;  %v4251_v11 = vld [vmem:[#allocation15 + $0x18] sm:$0xff]  }
 0x40a   :  { %v4338_v12 = vpop.eup %4337 }
 0x40b   :  { %v1442_v14 = vmul.f32 %v4338_v12, %v4322_v40  ;;  %v4252_v12 = vld [vmem:[#allocation15 + $0xb8] sm:$0xff]  }
 0x40c   :  { %v1645_v15 = vpop.xlane.xlu0 %1644 }
 0x40d   :  { %4341 = vrcp.f32 %v1645_v15  ;;  %v1443_v16 = vpack.c.bf16 %v1442_v14, %v1442_v14  ;;  %v4254_v14 = vld [vmem:[#allocation15 + $0xf0] sm:$0xff]  }
 0x40e   :  { %v4255_v15 = vld [vmem:[#allocation15 + $0x10] sm:$0xff]  }
 0x40f   :  { %4034 = vmatmul.mubr.msk.bf16.vlgmr.msra.gmra.mxu1 %vm1431_vm2, %v1443_v16  ;;  %v4256_v16 = vld [vmem:[#allocation15 + $0xb0] sm:$0xff]  }
 0x410   :  { %4044 = vmatpush3.bf16.msra.mxu1 %v1551_v17  ;;  %4045 = vmatprep.mubr.msk.bf16.mxu1 %vm4659_vm0, %v4658_v21  ;;  %v4257_v17 = vld [vmem:[#allocation15 + $0x48] sm:$0xff]  }
 0x411   :  { %4055 = vmatprep.subr.bf16.mxu1 %v4658_v21 }
 0x412   :  { %v4340_v20 = vpop.eup %4339 }
 0x413   :  { %v1545_v23 = vmul.f32 %v4340_v20, %v4324_v45  ;;  %v1904_v45 = vpack.c.bf16 %v4901_v34, %v4901_v34  ;;  %v4260_v20 = vld [vmem:[#allocation15 + $0xa8] sm:$0xff]  }
 0x414   :  { %v1747_v24 = vpop.xlane.xlu1 %1746 }
 0x415   :  { %4343 = vrcp.f32 %v1747_v24  ;;  %v1546_v25 = vpack.c.bf16 %v1545_v23, %v1545_v23  ;;  %v1961_v47 = vsel %vm1447_vm1, %v1904_v45, 0  ;;  %v4261_v23 = vld [vmem:[#allocation15 + $0x40] sm:$0xff]  }
 0x416   :  { %v4262_v24 = vld [vmem:[#allocation15 + $0xe0] sm:$0xff]  }
 0x417   :  { %4046 = vmatmul.mubr.msk.bf16.vlgmr.msra.gmra.mxu1 %vm1431_vm2, %v1546_v25  ;;  %v4264_v25 = vld [vmem:[#allocation15 + $0xa0] sm:$0xff]  }
 0x418   :  { %4056 = vmatpush3.bf16.msra.mxu1 %v1653_v32  ;;  %4057 = vmatprep.mubr.msk.bf16.mxu1 %vm4659_vm0, %v4658_v21  ;;  %v4263_v32 = vld [vmem:[#allocation15] sm:$0xff]  }
 0x419   :  { %4067 = vmatprep.subr.bf16.mxu1 %v4658_v21 }
 0x41a   :  { %v4342_v26 = vpop.eup %4341 }
 0x41b   :  { %v1647_v29 = vmul.f32 %v4342_v26, %v4326_v48  ;;  %v1382_v48 = vpop.f32.mrf.mxu1  ;;  %v4265_v26 = vld [vmem:[#allocation15 + $0xd8] sm:$0xff]  }
 0x41c   :  { %v1851_v30 = vpop.xlane.xlu0 %1850  ;;  %v2006_v50 = vpack.c.bf16 %v1382_v48, %v1382_v48 }
 0x41d   :  { %4345 = vrcp.f32 %v1851_v30  ;;  %v1648_v31 = vpack.c.bf16 %v1647_v29, %v1647_v29  ;;  %v4268_v29 = vld [vmem:[#allocation15 + $0x90] sm:$0xff]   ;;  %v4269_v30 = vld [vmem:[#allocation15 + $0xc8] sm:$0xff]  }
 0x41e   :  { %v2063_v52 = vsel %vm1447_vm1, %v2006_v50, 0 }
 0x41f   :  { %4058 = vmatmul.mubr.msk.bf16.vlgmr.msra.gmra.mxu1 %vm1431_vm2, %v1648_v31  ;;  %v4270_v31 = vld [vmem:[#allocation15 + $0x88] sm:$0xff]  }
 0x420   :  { %4068 = vmatpush3.bf16.msra.mxu1 %v1755_v35  ;;  %4069 = vmatprep.mubr.msk.bf16.mxu1 %vm4659_vm0, %v4658_v21  ;;  %v4271_v35 = vld [vmem:[#allocation15 + $0xc0] sm:$0xff]  }
 0x421   :  { %4079 = vmatprep.subr.bf16.mxu1 %v4658_v21 }
 0x422   :  { %v4344_v36 = vpop.eup %4343 }
 0x423   :  { %v1749_v40 = vmul.f32 %v4344_v36, %v4914_v53  ;;  %v1384_v53 = vpop.f32.mrf.mxu1  ;;  %v4272_v36 = vld [vmem:[#allocation15 + $0x80] sm:$0xff]  }
 0x424   :  { %v1953_v1 = vpop.xlane.xlu1 %1952  ;;  %v2108_v55 = vpack.c.bf16 %v1384_v53, %v1384_v53 }
 0x425   :  { %4347 = vrcp.f32 %v1953_v1  ;;  %v1750_v2 = vpack.c.bf16 %v1749_v40, %v1749_v40 }
 0x427   :  { %4070 = vmatmul.mubr.msk.bf16.vlgmr.msra.gmra.mxu1 %vm1431_vm2, %v1750_v2 }
 0x428   :  { %4080 = vmatpush3.bf16.msra.mxu1 %v1859_v41  ;;  %4081 = vmatprep.mubr.msk.bf16.mxu1 %vm4659_vm0, %v4658_v21 }
 0x429   :  { %4091 = vmatprep.subr.bf16.mxu1 %v4658_v21 }
 0x42a   :  { %v4346_v44 = vpop.eup %4345 }
 0x42b   :  { %v1853_v33 = vmul.f32 %v4346_v44, %v4918_v60  ;;  %v2165_v60 = vsel %vm1447_vm1, %v2108_v55, 0 }
 0x42c   :  { %v2055_v46 = vpop.xlane.xlu0 %2054 }
 0x42d   :  { %4349 = vrcp.f32 %v2055_v46  ;;  %v1854_v37 = vpack.c.bf16 %v1853_v33, %v1853_v33 }
 0x42f   :  { %4082 = vmatmul.mubr.msk.bf16.vlgmr.msra.gmra.mxu1 %vm1431_vm2, %v1854_v37 }
 0x430   :  { %4092 = vmatpush3.bf16.msra.mxu1 %v1961_v47  ;;  %4093 = vmatprep.mubr.msk.bf16.mxu1 %vm4659_vm0, %v4658_v21 }
 0x431   :  { %4103 = vmatprep.subr.bf16.mxu1 %v4658_v21 }
 0x432   :  { %v4348_v42 = vpop.eup %4347 }
 0x433   :  { %v1955_v34 = vmul.f32 %v4348_v42, %v4922_v4  ;;  %v4242_v4 = vld [vmem:[#allocation15 + $0x38] sm:$0xff]  }
 0x434   :  { %v2157_v49 = vpop.xlane.xlu1 %2156  ;;  %3938 = vmatpush3.bf16.msra.mxu0 %v4242_v4 }
 0x435   :  { %4351 = vrcp.f32 %v2157_v49  ;;  %v1956_v51 = vpack.c.bf16 %v1955_v34, %v1955_v34  ;;  %3939 = vmatprep.subr.bf16.mxu0 %v4243_v43 }
 0x437   :  { %4094 = vmatmul.mubr.msk.bf16.vlgmr.msra.gmra.mxu1 %vm1431_vm2, %v1956_v51 }
 0x438   :  { %4104 = vmatpush3.bf16.msra.mxu1 %v2063_v52  ;;  %4105 = vmatprep.mubr.msk.bf16.mxu1 %vm4659_vm0, %v4658_v21 }
 0x439   :  { %4115 = vmatprep.subr.bf16.mxu1 %v4658_v21  ;;  %3940 = vmatpush3.bf16.msra.mxu0 %v4244_v5 }
 0x43a   :  { %v4350_v54 = vpop.eup %4349 }
 0x43b   :  { %v2057_v56 = vmul.f32 %v4350_v54, %v4926_v6  ;;  %v4245_v6 = vld [vmem:[#allocation15 + $0x68] sm:$0xff]  }
 0x43c   :  { %3941 = vmatprep.subr.bf16.mxu0 %v4245_v6 }
 0x43d   :  { %v2058_v57 = vpack.c.bf16 %v2057_v56, %v2057_v56  ;;  %3942 = vmatpush3.bf16.msra.mxu0 %v4246_v7 }
 0x43e   :  { %3943 = vmatprep.subr.bf16.mxu0 %v4247_v9 }
 0x43f   :  { %4106 = vmatmul.mubr.msk.bf16.vlgmr.msra.gmra.mxu1 %vm1431_vm2, %v2058_v57 }
 0x440   :  { %4116 = vmatpush3.bf16.msra.mxu1 %v2165_v60  ;;  %4117 = vmatprep.mubr.msk.bf16.mxu1 %vm4659_vm0, %v4658_v21  ;;  %v4248_v21 = vld [vmem:[#allocation15 + $0x20] sm:$0xff]  }
 0x441   :  { %3944 = vmatpush3.bf16.msra.mxu0 %v4248_v21  ;;  %3959 = vmatprep.subr.bf16.mxu1 %v4250_v10  ;;  %v513_v10 = vadd.f32 %v4856_v38, %v4870_v58 }
 0x442   :  { %v4352_v61 = vpop.eup %4351 }
 0x443   :  { %v2159_v62 = vmul.f32 %v4352_v61, %v4930_v8  ;;  %v4249_v8 = vld [vmem:[#allocation15 + $0x58] sm:$0xff]  }
 0x444   :  { %3945 = vmatprep.subr.bf16.mxu0 %v4249_v8 }
 0x445   :  { %v2160_v63 = vpack.c.bf16 %v2159_v62, %v2159_v62  ;;  %3946 = vmatpush3.bf16.msra.mxu0 %v4251_v11  ;;  %v3669_v11 = vmul.f32 -1.442695, %v513_v10  ;;  %v2652_v10 = vld [vmem:[#allocation17 + $0x148] sm:$0xff] }
 0x446   :  { %3947 = vmatprep.subr.bf16.mxu0 %v4253_v13 }
 0x447   :  { %4118 = vmatmul.mubr.msk.bf16.vlgmr.msra.gmra.mxu1 %vm1431_vm2, %v2160_v63  ;;  %4353 = vpow2.f32 %v3669_v11 }
 0x448   :  { %3960 = vmatpush3.bf16.msra.mxu1 %v4252_v12 }
 0x449   :  { %3961 = vmatprep.subr.bf16.mxu1 %v4254_v14  ;;  %3948 = vmatpush3.bf16.msra.mxu0 %v4255_v15 }
 0x44a   :  { %3949 = vmatprep.subr.bf16.mxu0 %v4257_v17 }
 0x44c   :  { %3962 = vmatpush3.bf16.msra.mxu1 %v4256_v16 }
 0x44d   :  { %3963 = vmatprep.subr.bf16.mxu1 %v4258_v18  ;;  %3950 = vmatpush3.bf16.msra.mxu0 %v4259_v19 }
 0x44e   :  { %3951 = vmatprep.subr.bf16.mxu0 %v4261_v23 }
 0x450   :  { %3964 = vmatpush3.bf16.msra.mxu1 %v4260_v20 }
 0x451   :  { %3965 = vmatprep.subr.bf16.mxu1 %v4262_v24  ;;  %3952 = vmatpush3.bf16.msra.mxu0 %v4263_v32 }
 0x454   :  { %3966 = vmatpush3.bf16.msra.mxu1 %v4264_v25  ;;  %v4354_v12 = vpop.eup %4353 }
 0x455   :  { %3967 = vmatprep.subr.bf16.mxu1 %v4265_v26  ;;  %v521_v13 = vadd.f32 1.0, %v4354_v12  ;;  %v2656_v12 = vld [vmem:[#allocation17 + $0x168] sm:$0xff] }
 0x457   :  { %4355 = vrcp.f32 %v521_v13 }
 0x458   :  { %3968 = vmatpush3.bf16.msra.mxu1 %v4266_v27  ;;  %v4381_v27 = vld [vmem:[#allocation3] sm:$0xff] }
 0x459   :  { %3969 = vmatprep.subr.bf16.mxu1 %v4267_v28 }
 0x45c   :  { %3970 = vmatpush3.bf16.msra.mxu1 %v4268_v29 }
 0x45d   :  { %3971 = vmatprep.subr.bf16.mxu1 %v4269_v30 }
 0x460   :  { %3972 = vmatpush3.bf16.msra.mxu1 %v4270_v31 }
 0x461   :  { %3973 = vmatprep.subr.bf16.mxu1 %v4271_v35  ;;  %v4382_v35 = vld [vmem:[#allocation3 + $0x8] sm:$0xff] }
 0x464   :  { %3974 = vmatpush3.bf16.msra.mxu1 %v4272_v36  ;;  %v4356_v58 = vpop.eup %4355 }
 0x465   :  { %v527_v31 = vmul.f32 %v4356_v58, %v4872_v59  ;;  %v2664_v59 = vld [vmem:[#allocation17 + $0x1a8] sm:$0xff] }
 0x466   :  { %v2640_v58 = vld [vmem:[#allocation17 + $0xe8] sm:$0xff] }
 0x4cf   :  { %v1485_v39 = vpop.f32.mrf.mxu1 }
 0x4d1   :  { %v4035_v40 = vpop.f32.mrf.mxu1 }
 0x4d3   :  { %v1488_v1 = vpop.f32.mrf.mxu1 }
 0x4d5   :  { %v4036_v2 = vpop.f32.mrf.mxu1 }
 0x4d6   :  { %v2667_v2 = vld [vmem:[#allocation17 + $0x1c0] sm:$0xff] }
 0x4d7   :  { %v1587_v41 = vpop.f32.mrf.mxu1 }
 0x4d9   :  { %v4047_v44 = vpop.f32.mrf.mxu1 }
 0x4da   :  { %v2668_v44 = vld [vmem:[#allocation17 + $0x1c8] sm:$0xff] }
 0x4db   :  { %v1590_v45 = vpop.f32.mrf.mxu1 }
 0x4dd   :  { %v4048_v33 = vpop.f32.mrf.mxu1 }
 0x4df   :  { %v1689_v46 = vpop.f32.mrf.mxu1 }
 0x4e1   :  { %v4059_v37 = vpop.f32.mrf.mxu1 }
 0x4e2   :  { %v2659_v37 = vld [vmem:[#allocation17 + $0x180] sm:$0xff] }
 0x4e3   :  { %v1692_v47 = vpop.f32.mrf.mxu1 }
 0x4e4   :  { %v2663_v47 = vld [vmem:[#allocation17 + $0x1a0] sm:$0xff] }
 0x4e5   :  { %v4060_v42 = vpop.f32.mrf.mxu1 }
 0x4e7   :  { %v1791_v48 = vpop.f32.mrf.mxu1 }
 0x4e9   :  { %v4071_v50 = vpop.f32.mrf.mxu1 }
 0x4ea   :  { %v2660_v50 = vld [vmem:[#allocation17 + $0x188] sm:$0xff] }
 0x4eb   :  { %v1794_v34 = vpop.f32.mrf.mxu1 }
 0x4ec   :  { %v3860_v34 = vcombine.high %v2660_v50, %v2664_v59 }
 0x4ed   :  { %v4072_v49 = vpop.f32.mrf.mxu1 }
 0x4ee   :  { %v3857_v49 = vcombine.low %v2659_v37, %v2663_v47 }
 0x4ef   :  { %v1895_v51 = vpop.f32.mrf.mxu1 }
 0x4f0   :  { %v2216_v57 = vpack.c.bf16 %v1895_v51, %v1485_v39  ;;  %v3859_v51 = vcombine.low %v2660_v50, %v2664_v59  ;;  %v2674_v50 = vld [vmem:[#allocation17 + $0x1f8] sm:$0xff] }
 0x4f1   :  { %v4083_v52 = vpop.f32.mrf.mxu1 }
 0x4f3   :  { %v1898_v53 = vpop.f32.mrf.mxu1 }
 0x4f5   :  { %v4084_v54 = vpop.f32.mrf.mxu1 }
 0x4f7   :  { %v1997_v55 = vpop.f32.mrf.mxu1 }
 0x4f8   :  { %v2217_v56 = vpack.c.bf16 %v1997_v55, %v1587_v41  ;;  %v2671_v41 = vld [vmem:[#allocation17 + $0x1e0] sm:$0xff] }
 0x4f9   :  { %v4095_v60 = vpop.f32.mrf.mxu1  ;;  %v3865_v45 = vcombine.low %v2667_v2, %v2671_v41  ;;  %v3866_v33 = vcombine.high %v2667_v2, %v2671_v41  ;;  %v2619_v2 = vld [vmem:[#allocation17 + $0x40] sm:$0xff] }
 0x4fa   :  { %2508 = vmatprep.mubr.bf16.mxu0 %v2217_v56  ;;  %v2623_v41 = vld [vmem:[#allocation17 + $0x60] sm:$0xff] }
 0x4fb   :  { %v2000_v61 = vpop.f32.mrf.mxu1  ;;  %2509 = vmatmul.mubr.bf16.vlgmr.msra.gmra.mxu0 %v2216_v57  ;;  %2995 = vmatprep.subr.bf16.mxu0 %v3866_v33 }
 0x4fc   :  { %3027 = vmatprep.mubr.bf16.mxu0 %v4657_v0  ;;  %2996 = vmatpush1.bf16.msra.mxu0 %v3865_v45  ;;  %v3807_v61 = vld [vmem:[%s5099_s11] ss:$0 sm:$0xff]  ;;  %v2624_v45 = vld [vmem:[#allocation17 + $0x68] sm:$0xff] }
 0x4fd   :  { %v4096_v62 = vpop.f32.mrf.mxu1 }
 0x4ff   :  { %v2099_v63 = vpop.f32.mrf.mxu1 }
 0x500   :  { %v2218_v7 = vpack.c.bf16 %v2099_v63, %v1689_v46  ;;  %v2672_v46 = vld [vmem:[#allocation17 + $0x1e8] sm:$0xff] }
 0x501   :  { %v4107_v3 = vpop.f32.mrf.mxu1  ;;  %v3867_v42 = vcombine.low %v2668_v44, %v2672_v46 }
 0x503   :  { %v2102_v4 = vpop.f32.mrf.mxu1 }
 0x505   :  { %v4108_v43 = vpop.f32.mrf.mxu1 }
 0x507   :  { %v2201_v5 = vpop.f32.mrf.mxu1 }
 0x508   :  { %v2219_v6 = vpack.c.bf16 %v2201_v5, %v1791_v48  ;;  %v3868_v48 = vcombine.high %v2668_v44, %v2672_v46  ;;  %v2620_v44 = vld [vmem:[#allocation17 + $0x48] sm:$0xff]  ;;  %v4997_v46 = vld [vmem:[#allocation17 + $0x1d0] sm:$0xff] }
 0x509   :  { %v4119_v9 = vpop.f32.mrf.mxu1  ;;  %v3820_v59 = vcombine.high %v2620_v44, %v2624_v45 }
 0x50a   :  { %2549 = vmatprep.mubr.bf16.mxu1 %v2219_v6  ;;  %3038 = vmatprep.subr.bf16.mxu1 %v3868_v48 }
 0x50b   :  { %v2204_v21 = vpop.f32.mrf.mxu1  ;;  %2550 = vmatmul.mubr.bf16.vlgmr.msra.gmra.mxu1 %v2218_v7 }
 0x50c   :  { %3070 = vmatprep.mubr.bf16.mxu1 %v4657_v0  ;;  %3039 = vmatpush1.bf16.msra.mxu1 %v3867_v42  ;;  %v2651_v21 = vld [vmem:[#allocation17 + $0x140] sm:$0xff]  ;;  %v3818_v42 = vcombine.high %v2619_v2, %v2623_v41 }
 0x50d   :  { %v4120_v8 = vpop.f32.mrf.mxu1  ;;  %3040 = vmatprep.subr.bf16.mxu1 %v3860_v34  ;;  %v2611_v34 = vld [vmem:[#allocation17] sm:$0xff] }
 0x50e   :  { %v2655_v8 = vld [vmem:[#allocation17 + $0x160] sm:$0xff] }
 0x50f   :  { %v3850_v11 = vcombine.high %v2651_v21, %v2655_v8  ;;  %v3849_v13 = vcombine.low %v2651_v21, %v2655_v8 }
 0x510   :  { %3041 = vmatpush1.bf16.msra.mxu1 %v3859_v51 }
 0x5bb   :  { %v3953_v14 = vpop.f32.mrf.mxu0 }
 0x5bd   :  { %v3954_v15 = vpop.f32.mrf.mxu0 }
 0x5be   :  { %v3955_v19 = vadd.f32 %v3954_v15, %v3953_v14  ;;  %v3851_v14 = vcombine.low %v2652_v10, %v2656_v12  ;;  %v3852_v15 = vcombine.high %v2652_v10, %v2656_v12  ;;  %v3808_v12 = vld [vmem:[%s5100_s12] ss:$0 sm:$0xff]  ;;  %s4660_s12 = smov [#allocation21]  }
 0x5bf   :  { %v3956_v16 = vpop.f32.mrf.mxu0  ;;  %s3610_s8 = sshll.u32 %s4660_s12, 4  ;;  %s3611_s8 = int_to_ptr.vmem [resolvable:$true] %s3610_s8 }
 0x5c0   :  { %3042 = vmatprep.subr.bf16.mxu1 %v3852_v15  ;;  %v2665_v15 = vld [vmem:[#allocation17 + $0x1b0] sm:$0xff]  ;;  %s4583_s0 = scalar_lea.vmem %s3611_s8, 256  ;;  %p4588_p9 = scmp.lt.s32.totalorder %s3611_s8, %s3611_s8 }
 0x5c1   :  { %v3957_v23 = vpop.f32.mrf.mxu0  ;;  %3043 = vmatpush1.bf16.msra.mxu1 %v3851_v14  ;;  %v2661_v14 = vld [vmem:[#allocation17 + $0x190] sm:$0xff]  ;;  %p4584_p8 = scmp.ne.s32.totalorder %s3611_s8, %s4583_s0  ;;  %p4589_p10 = scmp.lt.s32.totalorder %s4583_s0, %s4583_s0 }
 0x5c2   :  { %v3958_v26 = vadd.f32 %v3957_v23, %v3956_v16  ;;  %v2643_v16 = vld [vmem:[#allocation17 + $0x100] sm:$0xff] }
 0x5c3   :  { %p4590_p11 = por %p4589_p10, %p4588_p9 }
 0x5c5   :  { %p4591_p12 = pnand %p4590_p11, %p4584_p8 }
 0x5cb   :  { %v3975_v17 = vpop.f32.mrf.mxu1 }
 0x5cd   :  { %v3976_v18 = vpop.f32.mrf.mxu1 }
 0x5ce   :  { %v3977_v20 = vadd.f32 %v3976_v18, %v3975_v17  ;;  %v2647_v17 = vld [vmem:[#allocation17 + $0x120] sm:$0xff]  ;;  %v2644_v18 = vld [vmem:[#allocation17 + $0x108] sm:$0xff] }
 0x5cf   :  { %v3978_v24 = vpop.f32.mrf.mxu1  ;;  %v3841_v23 = vcombine.low %v2643_v16, %v2647_v17 }
 0x5d0   :  { %v2552_v32 = vadd.f32 %v3977_v20, %v3955_v19  ;;  %v3842_v19 = vcombine.high %v2643_v16, %v2647_v17  ;;  %v2648_v20 = vld [vmem:[#allocation17 + $0x128] sm:$0xff]  ;;  %v2662_v16 = vld [vmem:[#allocation17 + $0x198] sm:$0xff] }
 0x5d1   :  { %v3979_v25 = vpop.f32.mrf.mxu1  ;;  %v2666_v17 = vld [vmem:[#allocation17 + $0x1b8] sm:$0xff] }
 0x5d2   :  { %v2558_v28 = vadd.f32 %v4381_v27, %v2552_v32  ;;  %v3980_v38 = vadd.f32 %v3979_v25, %v3978_v24  ;;  %v3843_v24 = vcombine.low %v2644_v18, %v2648_v20  ;;  %v3844_v32 = vcombine.high %v2644_v18, %v2648_v20  ;;  %v2635_v25 = vld [vmem:[#allocation17 + $0xc0] sm:$0xff]  ;;  %v2636_v27 = vld [vmem:[#allocation17 + $0xc8] sm:$0xff] }
 0x5d4   :  { %v2555_v29 = vadd.f32 %v3980_v38, %v3958_v26  ;;  %v2560_v30 = vadd.f32 %v2558_v28, %v4862_v22  ;;  %v3858_v22 = vcombine.high %v2659_v37, %v2663_v47  ;;  %v2639_v26 = vld [vmem:[#allocation17 + $0xe0] sm:$0xff]  ;;  %3044 = vmatprep.subr.bf16.mxu1 %v3844_v32  ;;  %v4999_v37 = vld [vmem:[#allocation17 + $0x1f0] sm:$0xff] }
 0x5d5   :  { %v3833_v28 = vcombine.low %v2635_v25, %v2639_v26  ;;  %v3834_v38 = vcombine.high %v2635_v25, %v2639_v26  ;;  %3045 = vmatpush1.bf16.msra.mxu1 %v3843_v24  ;;  %v3869_v48 = vcombine.low %v4997_v46, %v4999_v37  ;;  %v3864_v24 = vcombine.high %v2662_v16, %v2666_v17  ;;  %v2653_v32 = vld [vmem:[#allocation17 + $0x150] sm:$0xff]  ;;  %v2654_v26 = vld [vmem:[#allocation17 + $0x158] sm:$0xff] }
 0x5d6   :  { %v2559_v36 = vadd.f32 %v4382_v35, %v2555_v29  ;;  %v2563_v39 = vmul.f32 %v2560_v30, %v2560_v30  ;;  %2997 = vmatprep.subr.bf16.mxu0 %v3858_v22  ;;  %v2627_v29 = vld [vmem:[#allocation17 + $0x80] sm:$0xff]  ;;  %v3836_v35 = vcombine.high %v2636_v27, %v2640_v58  ;;  %v2670_v22 = vld [vmem:[#allocation17 + $0x1d8] sm:$0xff]  ;;  %v2657_v25 = vld [vmem:[#allocation17 + $0x170] sm:$0xff] }
 0x5d7   :  { %2998 = vmatpush1.bf16.msra.mxu0 %v3857_v49  ;;  %v2615_v49 = vld [vmem:[#allocation17 + $0x20] sm:$0xff]  ;;  %v3871_v51 = vcombine.low %v2670_v22, %v2674_v50 }
 0x5d8   :  { %2565 = vadd.xlane.f32.xlu0 %v2563_v39  ;;  %v2561_v40 = vadd.f32 %v2559_v36, %v527_v31  ;;  %2999 = vmatprep.subr.bf16.mxu0 %v3850_v11  ;;  %v3835_v31 = vcombine.low %v2636_v27, %v2640_v58  ;;  %v2628_v39 = vld [vmem:[#allocation17 + $0x88] sm:$0xff]  ;;  %v2658_v27 = vld [vmem:[#allocation17 + $0x178] sm:$0xff]  ;;  %v3854_v58 = vcombine.high %v2653_v32, %v2657_v25 }
 0x5d9   :  { %3046 = vmatprep.subr.bf16.mxu1 %v3836_v35  ;;  %v2646_v35 = vld [vmem:[#allocation17 + $0x118] sm:$0xff] }
 0x5da   :  { %v2564_v1 = vmul.f32 %v2561_v40, %v2561_v40  ;;  %3047 = vmatpush1.bf16.msra.mxu1 %v3835_v31  ;;  %v2649_v31 = vld [vmem:[#allocation17 + $0x130] sm:$0xff] }
 0x5db   :  { %3000 = vmatpush1.bf16.msra.mxu0 %v3849_v13 }
 0x5dc   :  { %2567 = vadd.xlane.f32.xlu1 %v2564_v1  ;;  %3001 = vmatprep.subr.bf16.mxu0 %v3842_v19 }
 0x5df   :  { %3002 = vmatpush1.bf16.msra.mxu0 %v3841_v23  ;;  %v3862_v23 = vcombine.high %v2661_v14, %v2665_v15 }
 0x5e0   :  { %3003 = vmatprep.subr.bf16.mxu0 %v3834_v38  ;;  %v3863_v38 = vcombine.low %v2662_v16, %v2666_v17  ;;  %v4278_v16 = vld [vmem:[#allocation18 + $0xf0] sm:$0xff]  }
 0x5e1   :  { %v4279_v17 = vld [vmem:[#allocation18 + $0x30] sm:$0xff]  }
 0x5e3   :  { %3004 = vmatpush1.bf16.msra.mxu0 %v3833_v28  ;;  %v3861_v28 = vcombine.low %v2661_v14, %v2665_v15  ;;  %v4276_v14 = vld [vmem:[#allocation18 + $0xb8] sm:$0xff]   ;;  %v4277_v15 = vld [vmem:[#allocation18 + $0x70] sm:$0xff]  }
 0x661   :  { %v2566_v52 = vpop.xlane.xlu0 %2565 }
 0x662   :  { %v2569_v53 = vmul.f32 0.0078125, %v2566_v52  ;;  %v2612_v52 = vld [vmem:[#allocation17 + $0x8] sm:$0xff] }
 0x664   :  { %v2571_v54 = vadd.f32 1e-06, %v2569_v53  ;;  %v2616_v53 = vld [vmem:[#allocation17 + $0x28] sm:$0xff] }
 0x665   :  { %v2568_v55 = vpop.xlane.xlu1 %2567 }
 0x666   :  { %4357 = vrsqrt.f32 %v2571_v54  ;;  %v2570_v56 = vmul.f32 0.0078125, %v2568_v55  ;;  %v3817_v54 = vcombine.low %v2619_v2, %v2623_v41  ;;  %v3819_v55 = vcombine.low %v2620_v44, %v2624_v45  ;;  %v2637_v41 = vld [vmem:[#allocation17 + $0xd0] sm:$0xff]  ;;  %v2638_v45 = vld [vmem:[#allocation17 + $0xd8] sm:$0xff] }
 0x667   :  { %v2641_v44 = vld [vmem:[#allocation17 + $0xf0] sm:$0xff] }
 0x668   :  { %v2572_v57 = vadd.f32 1e-06, %v2570_v56  ;;  %v3810_v56 = vcombine.high %v2611_v34, %v2615_v49 }
 0x66a   :  { %4359 = vrsqrt.f32 %v2572_v57  ;;  %v3812_v57 = vcombine.high %v2612_v52, %v2616_v53 }
 0x673   :  { %v4358_v60 = vpop.eup %4357 }
 0x674   :  { %v2575_v62 = vmul.f32 %v4358_v60, %v2560_v30  ;;  %v3809_v60 = vcombine.low %v2611_v34, %v2615_v49 }
 0x676   :  { %v2583_v63 = vmul.f32 %v3807_v61, %v2575_v62  ;;  %v3870_v62 = vcombine.high %v4997_v46, %v4999_v37 }
 0x677   :  { %v4360_v3 = vpop.eup %4359 }
 0x678   :  { %v4989_v4 = vadd.f32 %v2583_v63, %v2560_v30  ;;  %v2576_v43 = vmul.f32 %v4360_v3, %v2561_v40  ;;  %v2631_v30 = vld [vmem:[#allocation17 + $0xa0] sm:$0xff]  ;;  %v3872_v63 = vcombine.high %v2670_v22, %v2674_v50  ;;  %v2630_v22 = vld [vmem:[#allocation17 + $0x98] sm:$0xff] }
 0x679   :  { %v3826_v36 = vcombine.high %v2627_v29, %v2631_v30  ;;  %v3825_v33 = vcombine.low %v2627_v29, %v2631_v30  ;;  %v3856_v29 = vcombine.high %v2654_v26, %v2658_v27  ;;  %v2645_v30 = vld [vmem:[#allocation17 + $0x110] sm:$0xff]  ;;  %v2634_v50 = vld [vmem:[#allocation17 + $0xb8] sm:$0xff] }
 0x67a   :  { %v2588_v5 = vmul.f32 %v4989_v4, %v4989_v4  ;;  %v2584_v6 = vmul.f32 %v3807_v61, %v2576_v43  ;;  %v3811_v61 = vcombine.low %v2612_v52, %v2616_v53  ;;  %v3845_v46 = vcombine.low %v2645_v30, %v2649_v31  ;;  %v2621_v52 = vld [vmem:[#allocation17 + $0x50] sm:$0xff] }
 0x67b   :  { %3005 = vmatprep.subr.bf16.mxu0 %v3826_v36  ;;  %v2650_v36 = vld [vmem:[#allocation17 + $0x138] sm:$0xff]  ;;  %v2625_v53 = vld [vmem:[#allocation17 + $0x70] sm:$0xff] }
 0x67c   :  { %2590 = vadd.xlane.f32.xlu0 %v2588_v5  ;;  %v4993_v7 = vadd.f32 %v2584_v6, %v2561_v40  ;;  %v2632_v40 = vld [vmem:[#allocation17 + $0xa8] sm:$0xff]  ;;  %3006 = vmatpush1.bf16.msra.mxu0 %v3825_v33  ;;  %v3848_v2 = vcombine.high %v2646_v35, %v2650_v36  ;;  %v2642_v33 = vld [vmem:[#allocation17 + $0xf8] sm:$0xff]  ;;  %v3847_v37 = vcombine.low %v2646_v35, %v2650_v36  ;;  %v4295_v35 = vld [vmem:[#allocation18 + $0x10] sm:$0xff]  }
 0x67d   :  { %v3828_v1 = vcombine.high %v2628_v39, %v2632_v40  ;;  %v3827_v47 = vcombine.low %v2628_v39, %v2632_v40  ;;  %3007 = vmatprep.subr.bf16.mxu0 %v3818_v42  ;;  %v3853_v39 = vcombine.low %v2653_v32, %v2657_v25  ;;  %v3855_v40 = vcombine.low %v2654_v26, %v2658_v27  ;;  %v2629_v42 = vld [vmem:[#allocation17 + $0x90] sm:$0xff]  ;;  %v4285_v32 = vld [vmem:[#allocation18 + $0x60] sm:$0xff]  }
 0x67e   :  { %v2589_v9 = vmul.f32 %v4993_v7, %v4993_v7  ;;  %v3839_v34 = vcombine.low %v2638_v45, %v2642_v33  ;;  %v4286_v25 = vld [vmem:[#allocation18 + $0xe0] sm:$0xff]   ;;  %v4296_v36 = vld [vmem:[#allocation18 + $0x90] sm:$0xff]  }
 0x67f   :  { %3048 = vmatprep.subr.bf16.mxu1 %v3828_v1  ;;  %v3846_v1 = vcombine.high %v2645_v30, %v2649_v31  ;;  %v4287_v26 = vld [vmem:[#allocation18 + $0x20] sm:$0xff]   ;;  %v4293_v30 = vld [vmem:[#allocation18 + $0x50] sm:$0xff]  }
 0x680   :  { %2592 = vadd.xlane.f32.xlu1 %v2589_v9  ;;  %3049 = vmatpush1.bf16.msra.mxu1 %v3827_v47  ;;  %v3838_v47 = vcombine.high %v2637_v41, %v2641_v44  ;;  %v4288_v27 = vld [vmem:[#allocation18 + $0xa0] sm:$0xff]   ;;  %v4294_v31 = vld [vmem:[#allocation18 + $0xd0] sm:$0xff]  }
 0x681   :  { %3050 = vmatprep.subr.bf16.mxu1 %v3820_v59  ;;  %3008 = vmatpush1.bf16.msra.mxu0 %v3817_v54  ;;  %v3837_v59 = vcombine.low %v2637_v41, %v2641_v44  ;;  %v2622_v54 = vld [vmem:[#allocation17 + $0x58] sm:$0xff]  ;;  %v4301_v41 = vld [vmem:[#allocation18 + $0x40] sm:$0xff]  }
 0x682   :  { %3009 = vmatprep.subr.bf16.mxu0 %v3810_v56  ;;  %v4302_v44 = vld [vmem:[#allocation18 + $0xc0] sm:$0xff]  }
 0x684   :  { %3051 = vmatpush1.bf16.msra.mxu1 %v3819_v55  ;;  %v2626_v55 = vld [vmem:[#allocation17 + $0x78] sm:$0xff] }
 0x685   :  { %3052 = vmatprep.subr.bf16.mxu1 %v3812_v57  ;;  %3010 = vmatpush1.bf16.msra.mxu0 %v3809_v60  ;;  %v3831_v57 = vcombine.low %v2630_v22, %v2634_v50  ;;  %v3822_v60 = vcombine.high %v2621_v52, %v2625_v53 }
 0x686   :  { %3081 = vmatprep.subr.bf16.mxu0 %v3870_v62  ;;  %v2613_v62 = vld [vmem:[#allocation17 + $0x10] sm:$0xff] }
 0x688   :  { %3053 = vmatpush1.bf16.msra.mxu1 %v3811_v61  ;;  %v3824_v61 = vcombine.high %v2622_v54, %v2626_v55 }
 0x689   :  { %3124 = vmatprep.subr.bf16.mxu1 %v3872_v63  ;;  %v2617_v63 = vld [vmem:[#allocation17 + $0x30] sm:$0xff] }
 0x705   :  { %v2591_v3 = vpop.xlane.xlu0 %2590 }
 0x706   :  { %v2594_v43 = vmul.f32 0.0078125, %v2591_v3  ;;  %v2614_v3 = vld [vmem:[#allocation17 + $0x18] sm:$0xff] }
 0x708   :  { %v2596_v5 = vadd.f32 1e-06, %v2594_v43  ;;  %v2618_v43 = vld [vmem:[#allocation17 + $0x38] sm:$0xff] }
 0x709   :  { %v2593_v6 = vpop.xlane.xlu1 %2592 }
 0x70a   :  { %4361 = vrsqrt.f32 %v2596_v5  ;;  %v2595_v9 = vmul.f32 0.0078125, %v2593_v6  ;;  %v3821_v5 = vcombine.low %v2621_v52, %v2625_v53  ;;  %v3823_v6 = vcombine.low %v2622_v54, %v2626_v55 }
 0x70c   :  { %v2597_v21 = vadd.f32 1e-06, %v2595_v9  ;;  %v3814_v9 = vcombine.high %v2613_v62, %v2617_v63 }
 0x70e   :  { %4363 = vrsqrt.f32 %v2597_v21  ;;  %v3816_v21 = vcombine.high %v2614_v3, %v2618_v43 }
 0x717   :  { %v4362_v8 = vpop.eup %4361 }
 0x718   :  { %v2600_v10 = vmul.f32 %v4362_v8, %v4989_v4  ;;  %v3813_v8 = vcombine.low %v2613_v62, %v2617_v63 }
 0x71a   :  { %v2608_v18 = vmul.f32 %v3808_v12, %v2600_v10  ;;  %v3815_v10 = vcombine.low %v2614_v3, %v2618_v43 }
 0x71b   :  { %v4364_v11 = vpop.eup %4363 }
 0x71c   :  { %v2601_v13 = vmul.f32 %v4364_v11, %v4993_v7  ;;  %v4273_v11 = vld [vmem:[#allocation18 + $0x78] sm:$0xff]  }
 0x71e   :  { %v2609_v19 = vmul.f32 %v3808_v12, %v2601_v13  ;;  %v4274_v12 = vld [vmem:[#allocation18 + $0xf8] sm:$0xff]  }
 0x71f   :  { %v4275_v13 = vld [vmem:[#allocation18 + $0x38] sm:$0xff]  }
 0x720   :  { %v5010_v20 = vpack.c.bf16 %v2609_v19, %v2608_v18  ;;  %v4280_v18 = vld [vmem:[#allocation18 + $0xb0] sm:$0xff]   ;;  %v4281_v19 = vld [vmem:[#allocation18 + $0x68] sm:$0xff]  }
 0x722   :  { %3028 = vmatmul.mubr.bf16.vlgmr.msra.gmra.mxu0 %v5010_v20  ;;  %3071 = vmatmul.mubr.bf16.vlgmr.msra.gmra.mxu1 %v5010_v20 }
 0x723   :  { %3082 = vmatpush1.bf16.msra.mxu0 %v3869_v48  ;;  %3125 = vmatpush1.bf16.msra.mxu1 %v3871_v51  ;;  %v2633_v48 = vld [vmem:[#allocation17 + $0xb0] sm:$0xff]  ;;  %v3832_v51 = vcombine.high %v2630_v22, %v2634_v50 }
 0x724   :  { %3083 = vmatprep.subr.bf16.mxu0 %v3862_v23  ;;  %3126 = vmatprep.subr.bf16.mxu1 %v3864_v24  ;;  %v3830_v49 = vcombine.high %v2629_v42, %v2633_v48  ;;  %v3829_v56 = vcombine.low %v2629_v42, %v2633_v48  ;;  %v4282_v23 = vld [vmem:[#allocation18 + $0xe8] sm:$0xff]  }
 0x725   :  { %3113 = vmatprep.mubr.bf16.mxu0 %v4657_v0  ;;  %3156 = vmatprep.mubr.bf16.mxu1 %v4657_v0  ;;  %v3840_v0 = vcombine.high %v2638_v45, %v2642_v33  ;;  %v4283_v24 = vld [vmem:[#allocation18 + $0x28] sm:$0xff]   ;;  %v4303_v45 = vld [vmem:[#allocation18] sm:$0xff]  }
 0x726   :  { %v4304_v33 = vld [vmem:[#allocation18 + $0x80] sm:$0xff]  }
 0x727   :  { %3084 = vmatpush1.bf16.msra.mxu0 %v3861_v28  ;;  %3127 = vmatpush1.bf16.msra.mxu1 %v3863_v38  ;;  %v4289_v28 = vld [vmem:[#allocation18 + $0x58] sm:$0xff]  }
 0x728   :  { %3085 = vmatprep.subr.bf16.mxu0 %v3854_v58  ;;  %3128 = vmatprep.subr.bf16.mxu1 %v3856_v29  ;;  %v4290_v38 = vld [vmem:[#allocation18 + $0xd8] sm:$0xff]  }
 0x729   :  { %v4291_v58 = vld [vmem:[#allocation18 + $0x18] sm:$0xff]  }
 0x72a   :  { %v4292_v29 = vld [vmem:[#allocation18 + $0x98] sm:$0xff]  }
 0x72b   :  { %3086 = vmatpush1.bf16.msra.mxu0 %v3853_v39  ;;  %3129 = vmatpush1.bf16.msra.mxu1 %v3855_v40  ;;  %v4297_v39 = vld [vmem:[#allocation18 + $0x48] sm:$0xff]  }
 0x72c   :  { %3087 = vmatprep.subr.bf16.mxu0 %v3846_v1  ;;  %3130 = vmatprep.subr.bf16.mxu1 %v3848_v2  ;;  %v4298_v40 = vld [vmem:[#allocation18 + $0xc8] sm:$0xff]  }
 0x72d   :  { %v4299_v1 = vld [vmem:[#allocation18 + $0x8] sm:$0xff]  }
 0x72e   :  { %v4300_v2 = vld [vmem:[#allocation18 + $0x88] sm:$0xff]  }
 0x72f   :  { %3088 = vmatpush1.bf16.msra.mxu0 %v3845_v46  ;;  %3131 = vmatpush1.bf16.msra.mxu1 %v3847_v37 }
 0x730   :  { %3089 = vmatprep.subr.bf16.mxu0 %v3838_v47  ;;  %3132 = vmatprep.subr.bf16.mxu1 %v3840_v0 }
 0x733   :  { %3090 = vmatpush1.bf16.msra.mxu0 %v3837_v59  ;;  %3133 = vmatpush1.bf16.msra.mxu1 %v3839_v34 }
 0x734   :  { %3091 = vmatprep.subr.bf16.mxu0 %v3830_v49  ;;  %3134 = vmatprep.subr.bf16.mxu1 %v3832_v51 }
 0x737   :  { %3092 = vmatpush1.bf16.msra.mxu0 %v3829_v56  ;;  %3135 = vmatpush1.bf16.msra.mxu1 %v3831_v57 }
 0x738   :  { %3093 = vmatprep.subr.bf16.mxu0 %v3822_v60  ;;  %3136 = vmatprep.subr.bf16.mxu1 %v3824_v61 }
 0x73b   :  { %3094 = vmatpush1.bf16.msra.mxu0 %v3821_v5  ;;  %3137 = vmatpush1.bf16.msra.mxu1 %v3823_v6 }
 0x73c   :  { %3095 = vmatprep.subr.bf16.mxu0 %v3814_v9  ;;  %3138 = vmatprep.subr.bf16.mxu1 %v3816_v21 }
 0x73f   :  { %3096 = vmatpush1.bf16.msra.mxu0 %v3813_v8  ;;  %3139 = vmatpush1.bf16.msra.mxu1 %v3815_v10 }
 0x740   :  { %3981 = vmatprep.subr.bf16.mxu0 %v4273_v11  ;;  %4003 = vmatprep.subr.bf16.mxu1 %v4274_v12 }
 0x742   :  { %3114 = vmatmul.mubr.bf16.vlgmr.msra.gmra.mxu0 %v5010_v20  ;;  %3157 = vmatmul.mubr.bf16.vlgmr.msra.gmra.mxu1 %v5010_v20  ;;  %v4284_v20 = vld [vmem:[#allocation18 + $0xa8] sm:$0xff]  }
 0x743   :  { %3982 = vmatpush3.bf16.msra.mxu0 %v4275_v13  ;;  %4004 = vmatpush3.bf16.msra.mxu1 %v4276_v14 }
 0x744   :  { %3983 = vmatprep.subr.bf16.mxu0 %v4277_v15  ;;  %4005 = vmatprep.subr.bf16.mxu1 %v4278_v16 }
 0x747   :  { %3984 = vmatpush3.bf16.msra.mxu0 %v4279_v17  ;;  %4006 = vmatpush3.bf16.msra.mxu1 %v4280_v18 }
 0x748   :  { %3985 = vmatprep.subr.bf16.mxu0 %v4281_v19  ;;  %4007 = vmatprep.subr.bf16.mxu1 %v4282_v23 }
 0x74b   :  { %3986 = vmatpush3.bf16.msra.mxu0 %v4283_v24  ;;  %4008 = vmatpush3.bf16.msra.mxu1 %v4284_v20 }
 0x74c   :  { %3987 = vmatprep.subr.bf16.mxu0 %v4285_v32  ;;  %4009 = vmatprep.subr.bf16.mxu1 %v4286_v25 }
 0x74f   :  { %3988 = vmatpush3.bf16.msra.mxu0 %v4287_v26  ;;  %4010 = vmatpush3.bf16.msra.mxu1 %v4288_v27 }
 0x750   :  { %3989 = vmatprep.subr.bf16.mxu0 %v4289_v28  ;;  %4011 = vmatprep.subr.bf16.mxu1 %v4290_v38 }
 0x753   :  { %3990 = vmatpush3.bf16.msra.mxu0 %v4291_v58  ;;  %4012 = vmatpush3.bf16.msra.mxu1 %v4292_v29 }
 0x754   :  { %3991 = vmatprep.subr.bf16.mxu0 %v4293_v30  ;;  %4013 = vmatprep.subr.bf16.mxu1 %v4294_v31 }
 0x757   :  { %3992 = vmatpush3.bf16.msra.mxu0 %v4295_v35  ;;  %4014 = vmatpush3.bf16.msra.mxu1 %v4296_v36 }
 0x758   :  { %3993 = vmatprep.subr.bf16.mxu0 %v4297_v39  ;;  %4015 = vmatprep.subr.bf16.mxu1 %v4298_v40 }
 0x75b   :  { %3994 = vmatpush3.bf16.msra.mxu0 %v4299_v1  ;;  %4016 = vmatpush3.bf16.msra.mxu1 %v4300_v2 }
 0x75c   :  { %3995 = vmatprep.subr.bf16.mxu0 %v4301_v41  ;;  %4017 = vmatprep.subr.bf16.mxu1 %v4302_v44 }
 0x75f   :  { %3996 = vmatpush3.bf16.msra.mxu0 %v4303_v45  ;;  %4018 = vmatpush3.bf16.msra.mxu1 %v4304_v33 }
 0x7e2   :  { %v5018_v46 = vpop.f32.mrf.mxu0  ;;  %v5020_v37 = vpop.f32.mrf.mxu1 }
 0x7e3   :  { %v3167_v47 = vmul.f32 %v5018_v46, %v5018_v46  ;;  %v3169_v0 = vmul.f32 %v5020_v37, %v5020_v37 }
 0x7e4   :  { %v5026_v42 = vpop.f32.mrf.mxu0  ;;  %v5028_v48 = vpop.f32.mrf.mxu1 }
 0x7e5   :  { %v3175_v22 = vmul.f32 %v3167_v47, %v5018_v46  ;;  %v3177_v50 = vmul.f32 %v3169_v0, %v5020_v37  ;;  %v3168_v59 = vmul.f32 %v5026_v42, %v5026_v42  ;;  %v3170_v34 = vmul.f32 %v5028_v48, %v5028_v48 }
 0x7e6   :  { %v5036_v49 = vpop.f32.mrf.mxu0  ;;  %v5038_v51 = vpop.f32.mrf.mxu1 }
 0x7e7   :  { %v3183_v52 = vmul.f32 0.044715, %v3175_v22  ;;  %v3185_v53 = vmul.f32 0.044715, %v3177_v50  ;;  %v3176_v54 = vmul.f32 %v3168_v59, %v5026_v42  ;;  %v3178_v55 = vmul.f32 %v3170_v34, %v5028_v48 }
 0x7e8   :  { %v3171_v56 = vmul.f32 %v5036_v49, %v5036_v49  ;;  %v3173_v57 = vmul.f32 %v5038_v51, %v5038_v51  ;;  %v5046_v60 = vpop.f32.mrf.mxu0  ;;  %v5048_v61 = vpop.f32.mrf.mxu1 }
 0x7e9   :  { %v3191_v62 = vadd.f32 %v3183_v52, %v5018_v46  ;;  %v3193_v63 = vadd.f32 %v3185_v53, %v5020_v37  ;;  %v3184_v3 = vmul.f32 0.044715, %v3176_v54  ;;  %v3186_v43 = vmul.f32 0.044715, %v3178_v55 }
 0x7ea   :  { %v3179_v5 = vmul.f32 %v3171_v56, %v5036_v49  ;;  %v3181_v6 = vmul.f32 %v3173_v57, %v5038_v51  ;;  %v3172_v9 = vmul.f32 %v5046_v60, %v5046_v60  ;;  %v3174_v21 = vmul.f32 %v5048_v61, %v5048_v61 }
 0x7eb   :  { %v3199_v8 = vmul.f32 0.7978846, %v3191_v62  ;;  %v3201_v10 = vmul.f32 0.7978846, %v3193_v63  ;;  %v3192_v11 = vadd.f32 %v3184_v3, %v5026_v42  ;;  %v3194_v12 = vadd.f32 %v3186_v43, %v5028_v48 }
 0x7ec   :  { %v3187_v13 = vmul.f32 0.044715, %v3179_v5  ;;  %v3189_v14 = vmul.f32 0.044715, %v3181_v6  ;;  %v3180_v15 = vmul.f32 %v3172_v9, %v5046_v60  ;;  %v3182_v16 = vmul.f32 %v3174_v21, %v5048_v61 }
 0x7ed   :  { %4365 = vtanh.f32 %v3199_v8  ;;  %v3200_v17 = vmul.f32 0.7978846, %v3192_v11  ;;  %v3202_v18 = vmul.f32 0.7978846, %v3194_v12 }
 0x7ee   :  { %4367 = vtanh.f32 %v3201_v10  ;;  %v3195_v19 = vadd.f32 %v3187_v13, %v5036_v49  ;;  %v3197_v23 = vadd.f32 %v3189_v14, %v5038_v51  ;;  %v3188_v24 = vmul.f32 0.044715, %v3180_v15 }
 0x7ef   :  { %4369 = vtanh.f32 %v3200_v17  ;;  %v3190_v20 = vmul.f32 0.044715, %v3182_v16 }
 0x7f0   :  { %4371 = vtanh.f32 %v3202_v18  ;;  %v3203_v32 = vmul.f32 0.7978846, %v3195_v19  ;;  %v3205_v25 = vmul.f32 0.7978846, %v3197_v23  ;;  %v3196_v26 = vadd.f32 %v3188_v24, %v5046_v60 }
 0x7f1   :  { %v3198_v27 = vadd.f32 %v3190_v20, %v5048_v61 }
 0x7f2   :  { %4373 = vtanh.f32 %v3203_v32  ;;  %v3204_v28 = vmul.f32 0.7978846, %v3196_v26 }
 0x7f3   :  { %4375 = vtanh.f32 %v3205_v25  ;;  %v3206_v38 = vmul.f32 0.7978846, %v3198_v27 }
 0x7f4   :  { %4377 = vtanh.f32 %v3204_v28 }
 0x7f5   :  { %4379 = vtanh.f32 %v3206_v38 }
 0x7fa   :  { %v4366_v58 = vpop.eup %4365 }
 0x7fb   :  { %v4368_v29 = vpop.eup %4367  ;;  %v3215_v36 = vadd.f32 1.0, %v4366_v58 }
 0x7fc   :  { %v4370_v30 = vpop.eup %4369  ;;  %v3217_v39 = vadd.f32 1.0, %v4368_v29 }
 0x7fd   :  { %v4372_v31 = vpop.eup %4371  ;;  %v3216_v35 = vadd.f32 1.0, %v4370_v30  ;;  %v3223_v50 = vmul.f32 0.5, %v3215_v36 }
 0x7fe   :  { %v3218_v40 = vadd.f32 1.0, %v4372_v31  ;;  %v3225_v34 = vmul.f32 0.5, %v3217_v39 }
 0x7ff   :  { %v4374_v1 = vpop.eup %4373  ;;  %v3224_v45 = vmul.f32 0.5, %v3216_v35  ;;  %v3231_v9 = vmul.f32 %v3223_v50, %v5018_v46 }
 0x800   :  { %v4376_v2 = vpop.eup %4375  ;;  %v3219_v41 = vadd.f32 1.0, %v4374_v1  ;;  %v3226_v33 = vmul.f32 0.5, %v3218_v40  ;;  %v3233_v21 = vmul.f32 %v3225_v34, %v5020_v37 }
 0x801   :  { %v4378_v44 = vpop.eup %4377  ;;  %v3221_v47 = vadd.f32 1.0, %v4376_v2  ;;  %v3232_v3 = vmul.f32 %v3224_v45, %v5026_v42 }
 0x802   :  { %v4380_v0 = vpop.eup %4379  ;;  %v3115_v22 = vpop.f32.mrf.mxu0  ;;  %v3227_v52 = vmul.f32 0.5, %v3219_v41  ;;  %v3220_v53 = vadd.f32 1.0, %v4378_v44  ;;  %v3234_v43 = vmul.f32 %v3226_v33, %v5028_v48 }
 0x803   :  { %v3158_v59 = vpop.f32.mrf.mxu1  ;;  %v3229_v54 = vmul.f32 0.5, %v3221_v47  ;;  %v3222_v55 = vadd.f32 1.0, %v4380_v0 }
 0x804   :  { %v3117_v56 = vpop.f32.mrf.mxu0  ;;  %v3235_v62 = vmul.f32 %v3227_v52, %v5036_v49  ;;  %v3228_v63 = vmul.f32 0.5, %v3220_v53  ;;  %v3241_v18 = vmul.f32 %v3233_v21, %v3158_v59 }
 0x805   :  { %v3160_v57 = vpop.f32.mrf.mxu1  ;;  %v3237_v5 = vmul.f32 %v3229_v54, %v5038_v51  ;;  %v3230_v6 = vmul.f32 0.5, %v3222_v55  ;;  %v3240_v42 = vmul.f32 %v3232_v3, %v3117_v56  ;;  %v3239_v51 = vmul.f32 %v3231_v9, %v3115_v22 }
 0x806   :  { %v3119_v8 = vpop.f32.mrf.mxu0  ;;  %v3236_v11 = vmul.f32 %v3228_v63, %v5046_v60  ;;  %v3242_v16 = vmul.f32 %v3234_v43, %v3160_v57 }
 0x807   :  { %v3162_v10 = vpop.f32.mrf.mxu1  ;;  %v3238_v12 = vmul.f32 %v3230_v6, %v5048_v61  ;;  %v3243_v13 = vmul.f32 %v3235_v62, %v3119_v8 }
 0x808   :  { %v3245_v49 = vmul.f32 %v3237_v5, %v3162_v10  ;;  %v3121_v14 = vpop.f32.mrf.mxu0 }
 0x809   :  { %v3164_v15 = vpop.f32.mrf.mxu1  ;;  %v3244_v48 = vmul.f32 %v3236_v11, %v3121_v14  ;;  %v3247_v23 = vpack.c.bf16 %v3243_v13, %v3239_v51 }
 0x80a   :  { %v3246_v17 = vmul.f32 %v3238_v12, %v3164_v15  ;;  %v3249_v37 = vpack.c.bf16 %v3245_v49, %v3241_v18 }
 0x80b   :  { %v3248_v19 = vpack.c.bf16 %v3244_v48, %v3240_v42 }
 0x80c   :  { %v3250_v46 = vpack.c.bf16 %v3246_v17, %v3242_v16 }
 0x80d   :  { %3539 = vmatprep.mubr.bf16.mxu0 %v3248_v19 }
 0x80e   :  { %3580 = vmatprep.mubr.bf16.mxu1 %v3250_v46  ;;  %3540 = vmatmul.mubr.bf16.vlgmr.msra.gmra.mxu0 %v3247_v23 }
 0x80f   :  { %3581 = vmatmul.mubr.bf16.vlgmr.msra.gmra.mxu1 %v3249_v37 }
 0x810   :  { %4594 = shalt.err (!%p4591_p12)
}
 0x811   :  { %3616 = dma.vmem_to_hbm [thread:$0]  %s3611_s8, 256, %s5104_s16, [#allocation22], %s4644_s18, %s4644_s18, %s4645_s19  }
 0x812   :  { %s4661_s22 = smov [#allocation20]  }
 0x813   :  { %s3598_s23 = sshll.u32 %s4661_s22, 4  ;;  %s3599_s23 = int_to_ptr.vmem [resolvable:$true] %s3598_s23 }
 0x814   :  { %s4603_s16 = scalar_lea.vmem %s3599_s23, 256  ;;  %p4608_p0 = scmp.lt.s32.totalorder %s3599_s23, %s3599_s23 }
 0x815   :  { %p4604_p13 = scmp.ne.s32.totalorder %s3599_s23, %s4603_s16  ;;  %p4609_p1 = scmp.lt.s32.totalorder %s4603_s16, %s4603_s16 }
 0x817   :  { %p4610_p2 = por %p4609_p1, %p4608_p0 }
 0x819   :  { %p4611_p3 = pnand %p4610_p2, %p4604_p13 }
 0x8ce   :  { %v3997_v60 = vpop.f32.mrf.mxu0 }
 0x8cf   :  { %v4019_v61 = vpop.f32.mrf.mxu1 }
 0x8d0   :  { %v3998_v24 = vpop.f32.mrf.mxu0 }
 0x8d1   :  { %v4020_v20 = vpop.f32.mrf.mxu1  ;;  %v3999_v32 = vadd.f32 %v3998_v24, %v3997_v60 }
 0x8d2   :  { %v4021_v25 = vadd.f32 %v4020_v20, %v4019_v61  ;;  %v4000_v26 = vpop.f32.mrf.mxu0 }
 0x8d3   :  { %v4022_v27 = vpop.f32.mrf.mxu1 }
 0x8d4   :  { %v3583_v28 = vadd.f32 %v4021_v25, %v3999_v32  ;;  %v4001_v38 = vpop.f32.mrf.mxu0 }
 0x8d5   :  { %v4023_v58 = vpop.f32.mrf.mxu1  ;;  %v4002_v30 = vadd.f32 %v4001_v38, %v4000_v26 }
 0x8d6   :  { %v3589_v29 = vadd.f32 %v3583_v28, %v4989_v4  ;;  %v4024_v31 = vadd.f32 %v4023_v58, %v4022_v27 }
 0x8d8   :  { %3591 = vst [vmem:[#allocation20] sm:$0xff] %v3589_v29  ;;  %v3586_v35 = vadd.f32 %v4024_v31, %v4002_v30 }
 0x8da   :  { %v3590_v36 = vadd.f32 %v3586_v35, %v4993_v7 }
 0x8dc   :  { %3592 = vst [vmem:[#allocation20 + $0x8] sm:$0xff] %v3590_v36 }
 0x8dd   :  { %4614 = shalt.err (!%p4611_p3)
}
 0x8de   :  { %3604 = dma.vmem_to_hbm [thread:$0]  %s3599_s23, 256, %s5103_s15, [#allocation5], %s4644_s18, %s4644_s18, %s4645_s19  }
 0x8df   :  { %4635 = dma.done.wait [#allocation5], 256  }
 0x8e0   :  { %4636 = vsyncadd [#allocation5], 4294967040 }
 0x8e1   :  { %4637 = dma.done.wait [#allocation22], 256  }
 0x8e2   :  { %4638 = vsyncadd [#allocation22], 4294967040 }
 0x8e3   :  { %3623 = vsyncpa [#allocation4], 1 }
 0x8e4   :  { %3624 = vsyncpa [#allocation7], 1 }
 0x8e5   :  { %3625 = vsyncpa [#allocation10], 1 }
 0x8e6   :  { %3626 = vsyncpa [#allocation13], 1 }
 0x8e7   :  { %3627 = vsyncpa [#allocation16], 1 }
 0x8e8   :  { %3628 = vsyncpa [#allocation19], 1 }
 0x8e9   :  { %3629 = vsyncpa [#allocation5], 1 }
 0x8ea   :  { %3630 = vsyncpa [#allocation22], 1 }

</bundles_post_ra>
